<compile_context>
chip_gen: v7x
topology: tpu7x:2x2x1
jax: 0.10.0
libtpu: 0.0.40
codegen_flags: <defaults>
</compile_context>

<pallas_src>
import functools

import jax
import jax.numpy as jnp
from jax.experimental import pallas as pl
from jax.experimental.pallas import tpu as pltpu


# ----------------------------- kernel ---------------------------------------


def _layernorm(x, w, b, eps):
    mu = jnp.mean(x, axis=-1, keepdims=True)
    var = jnp.mean((x - mu) * (x - mu), axis=-1, keepdims=True)
    return (x - mu) * jax.lax.rsqrt(var + eps) * w + b


def fused_seq_output_kernel(
    x_ref,
    ln1w_ref, ln1b_ref, wqkv_ref, bqkv_ref, wo_ref, bo_ref,
    ln2w_ref, ln2b_ref, w1_ref, b1_ref, w2_ref, b2_ref,
    rmsw_ref, wh_ref, bh_ref,
    o_ref,
    x_carry,
    *, num_heads, head_dim, seq_len, ln_eps, rms_eps,
):
    """One transformer layer step for one batch element.

    Grid = (batch, num_layers).  Activations for the current batch element
    are carried across layer steps in `x_carry` (VMEM scratch); the final
    RMSNorm + linear head run only on the last layer step.
    """
    l = pl.program_id(1)
    num_layers = pl.num_programs(1)
    L, H, dh = seq_len, num_heads, head_dim
    D = H * dh
    scale = 1.0 / (dh ** 0.5)

    # New batch element -> load its activations into the carry scratch.
    @pl.when(l == 0)
    def _():
        x_carry[...] = x_ref[...]

    x = x_carry[...]                                         # (L, D) f32

    # Causal mask (True where attention is allowed), built per-step from
    # iota -- 2-D, broadcast over heads; never materialized per batch.
    row = jax.lax.broadcasted_iota(jnp.int32, (L, L), 0)
    col = jax.lax.broadcasted_iota(jnp.int32, (L, L), 1)
    causal = (col <= row)[None]                              # (1, L, L)

    # ---------------- self-attention block (pre-LN) ----------------
    xn = _layernorm(x, ln1w_ref[...], ln1b_ref[...], ln_eps)
    qkv = jnp.dot(
        xn.astype(jnp.bfloat16), wqkv_ref[...],
        preferred_element_type=jnp.float32,
    ) + bqkv_ref[...]                                        # (L, 3D) f32

    # Fold 1/sqrt(dh) into q before QK^T (cheaper than scaling scores).
    q = (qkv[:, 0:D] * scale).reshape(L, H, dh)
    k = qkv[:, D:2 * D].reshape(L, H, dh)
    v = qkv[:, 2 * D:3 * D].reshape(L, H, dh)

    # All heads in one batched einsum pair (no per-head loop, no scratch).
    s = jnp.einsum(
        "qhd,khd->hqk",
        q.astype(jnp.bfloat16), k.astype(jnp.bfloat16),
        preferred_element_type=jnp.float32,
    )                                                        # (H, L, L) f32
    s = jnp.where(causal, s, -1e30)
    s = s - jnp.max(s, axis=-1, keepdims=True)
    p = jnp.exp(s)
    p = p * pl.reciprocal(jnp.sum(p, axis=-1, keepdims=True), approx=True)

    oh = jnp.einsum(
        "hqk,khd->qhd",
        p.astype(jnp.bfloat16), v.astype(jnp.bfloat16),
        preferred_element_type=jnp.float32,
    )                                                        # (L, H, dh)
    attn = jnp.dot(
        oh.reshape(L, D).astype(jnp.bfloat16), wo_ref[...],
        preferred_element_type=jnp.float32,
    ) + bo_ref[...]                                          # (L, D)
    x = x + attn

    # ---------------- feed-forward block (pre-LN) -------------------
    xn2 = _layernorm(x, ln2w_ref[...], ln2b_ref[...], ln_eps)
    h1 = jnp.dot(
        xn2.astype(jnp.bfloat16), w1_ref[...],
        preferred_element_type=jnp.float32,
    ) + b1_ref[...]
    h1 = jnp.maximum(h1, 0.0)                                # ReLU
    ff = jnp.dot(
        h1.astype(jnp.bfloat16), w2_ref[...],
        preferred_element_type=jnp.float32,
    ) + b2_ref[...]
    x = x + ff

    x_carry[...] = x

    # ---------------- final RMSNorm + linear head (lane-dense) ----------
    @pl.when(l == num_layers - 1)
    def _():
        ms = jnp.mean(x * x, axis=-1, keepdims=True)
        xf = x * jax.lax.rsqrt(ms + rms_eps) * rmsw_ref[...]
        o_ref[...] = jnp.dot(
            xf.astype(jnp.bfloat16), wh_ref[...],
            preferred_element_type=jnp.float32,
        ) + bh_ref[...]                                      # (L, V_PAD)


# ----------------------------- wrapper ---------------------------------------


def sequence_output_module_forward(inputs, params, *, output_name,
                                   max_length, embedding_dim, num_heads):
    """JAX/Pallas equivalent of SequenceOutputModule.forward (inference)."""
    out = inputs[output_name]
    B = out.shape[0]
    L, D = max_length, embedding_dim
    H = num_heads
    dh = D // H
    x = out.reshape(B * L, D).astype(jnp.float32)            # (B*L, D)

    num_layers = params["wqkv"].shape[0]
    DFF = params["w1"].shape[2]
    V = params["head_w"].shape[1]
    V_PAD = max(128, ((V + 127) // 128) * 128)                # lane-dense head

    # MXU operands in bf16 (f32 accumulation inside the kernel); everything
    # elementwise (LN/softmax/bias/residual) stays in f32.
    wqkv = params["wqkv"].astype(jnp.bfloat16)
    wo = params["wo"].astype(jnp.bfloat16)
    w1 = params["w1"].astype(jnp.bfloat16)
    w2 = params["w2"].astype(jnp.bfloat16)
    wh = jnp.pad(params["head_w"], ((0, 0), (0, V_PAD - V))).astype(jnp.bfloat16)
    bh = jnp.pad(params["head_b"], ((0, 0), (0, V_PAD - V)))

    kern = functools.partial(
        fused_seq_output_kernel,
        num_heads=H, head_dim=dh, seq_len=L, ln_eps=1e-5, rms_eps=1e-6,
    )

    # Per-layer streamed weight specs: leading `None` squeezes the layer
    # axis; only one layer's weights are resident (double-buffered).
    def wspec(*trailing):
        return pl.BlockSpec(
            (None,) + trailing, lambda b, l: (l,) + (0,) * len(trailing))

    in_specs = [
        pl.BlockSpec((L, D), lambda b, l: (b, 0)),            # x (one batch)
        wspec(1, D), wspec(1, D),                             # ln1 w, b
        wspec(D, 3 * D), wspec(1, 3 * D),                     # wqkv, bqkv
        wspec(D, D), wspec(1, D),                             # wo, bo
        wspec(1, D), wspec(1, D),                             # ln2 w, b
        wspec(D, DFF), wspec(1, DFF),                         # w1, b1
        wspec(DFF, D), wspec(1, D),                           # w2, b2
        pl.BlockSpec((1, D), lambda b, l: (0, 0)),            # rms_w (resident)
        pl.BlockSpec((D, V_PAD), lambda b, l: (0, 0)),        # head w (resident)
        pl.BlockSpec((1, V_PAD), lambda b, l: (0, 0)),        # head b (resident)
    ]

    logits_padded = pl.pallas_call(
        kern,
        out_shape=jax.ShapeDtypeStruct((B * L, V_PAD), jnp.float32),
        grid=(B, num_layers),
        in_specs=in_specs,
        out_specs=pl.BlockSpec((L, V_PAD), lambda b, l: (b, 0)),
        scratch_shapes=[pltpu.VMEM((L, D), jnp.float32)],     # activation carry
        compiler_params=pltpu.CompilerParams(
            # batch sharded across TensorCores (v7x); layers are sequential.
            dimension_semantics=("parallel", "arbitrary"),
            # Tiny footprint at these shapes; re-derive at production sizes.
            vmem_limit_bytes=32 * 1024 * 1024,
        ),
    )(x,
      params["ln1_w"], params["ln1_b"], wqkv, params["bqkv"],
      wo, params["bo"],
      params["ln2_w"], params["ln2_b"], w1, params["b1"], w2, params["b2"],
      params["rms_w"], wh, bh)

    logits = logits_padded[:, :V].reshape(B, L, V)
    return {output_name: logits}


# ----------------------------- param init ------------------------------------


def init_params(key, *, embedding_dim, num_heads, num_layers,
                dim_feedforward, num_tokens):
    """Layer weights stacked on a leading num_layers axis, QKV packed."""
    D, NL, DFF, V = embedding_dim, num_layers, dim_feedforward, num_tokens
    s = 0.05
    ks = jax.random.split(key, 5)
    return dict(
        ln1_w=jnp.ones((NL, 1, D), jnp.float32),
        ln1_b=jnp.zeros((NL, 1, D), jnp.float32),
        wqkv=s * jax.random.normal(ks[0], (NL, D, 3 * D), jnp.float32),
        bqkv=jnp.zeros((NL, 1, 3 * D), jnp.float32),
        wo=s * jax.random.normal(ks[1], (NL, D, D), jnp.float32),
        bo=jnp.zeros((NL, 1, D), jnp.float32),
        ln2_w=jnp.ones((NL, 1, D), jnp.float32),
        ln2_b=jnp.zeros((NL, 1, D), jnp.float32),
        w1=s * jax.random.normal(ks[2], (NL, D, DFF), jnp.float32),
        b1=jnp.zeros((NL, 1, DFF), jnp.float32),
        w2=s * jax.random.normal(ks[3], (NL, DFF, D), jnp.float32),
        b2=jnp.zeros((NL, 1, D), jnp.float32),
        rms_w=jnp.ones((1, D), jnp.float32),
        head_w=s * jax.random.normal(ks[4], (D, V), jnp.float32),
        head_b=jnp.zeros((1, V), jnp.float32),
    )


# ----------------------------- main -------------------------------------------


if __name__ == "__main__":
    # small, module-consistent shapes
    B = 2            # batch
    L = 8            # computed_max_length
    D = 32           # embedding_dim
    H = 4            # num_heads
    NUM_LAYERS = 2
    DFF = 128        # dim_feedforward (4 * embedding_dim)
    V = 16           # num_tokens = len(vocab)
    OUTPUT_NAME = "seq_output"

    key = jax.random.PRNGKey(0)
    params = init_params(
        jax.random.fold_in(key, 1),
        embedding_dim=D, num_heads=H, num_layers=NUM_LAYERS,
        dim_feedforward=DFF, num_tokens=V,
    )

    # the module reshapes input[output_name] to (B, L, D) -> provide (B, L*D)
    x = jax.random.normal(jax.random.fold_in(key, 2), (B, L * D), jnp.float32)
    inputs = {OUTPUT_NAME: x}

    out = sequence_output_module_forward(
        inputs, params,
        output_name=OUTPUT_NAME,
        max_length=L, embedding_dim=D, num_heads=H,
    )
    logits = jax.block_until_ready(out[OUTPUT_NAME])
    assert logits.shape == (B, L, V), logits.shape
    assert bool(jnp.all(jnp.isfinite(logits)))
    print("KERNEL_OK")
</pallas_src>

<mosaic_0001>
module attributes {stable_mosaic.version = 11 : i64} {
  func.func @fused_seq_output_kernel(%arg0: i32, %arg1: i32, %arg2: memref<8x32xf32, #tpu.memory_space<vmem>>, %arg3: memref<1x1x32xf32, #tpu.memory_space<vmem>>, %arg4: memref<1x1x32xf32, #tpu.memory_space<vmem>>, %arg5: memref<1x32x96xbf16, #tpu.memory_space<vmem>>, %arg6: memref<1x1x96xf32, #tpu.memory_space<vmem>>, %arg7: memref<1x32x32xbf16, #tpu.memory_space<vmem>>, %arg8: memref<1x1x32xf32, #tpu.memory_space<vmem>>, %arg9: memref<1x1x32xf32, #tpu.memory_space<vmem>>, %arg10: memref<1x1x32xf32, #tpu.memory_space<vmem>>, %arg11: memref<1x32x128xbf16, #tpu.memory_space<vmem>>, %arg12: memref<1x1x128xf32, #tpu.memory_space<vmem>>, %arg13: memref<1x128x32xbf16, #tpu.memory_space<vmem>>, %arg14: memref<1x1x32xf32, #tpu.memory_space<vmem>>, %arg15: memref<1x32xf32, #tpu.memory_space<vmem>>, %arg16: memref<32x128xbf16, #tpu.memory_space<vmem>>, %arg17: memref<1x128xf32, #tpu.memory_space<vmem>>, %arg18: memref<8x128xf32, #tpu.memory_space<vmem>>, %arg19: memref<8x32xf32, #tpu.memory_space<vmem>>) attributes {dimension_semantics = [#tpu.dimension_semantics<parallel>, #tpu.dimension_semantics<arbitrary>], iteration_bounds = array<i64: 2, 2>, scalar_prefetch = 0 : i64, scratch_operands = 1 : i64, tpu.core_type = #tpu.core_type<tc>, window_params = [{transform_indices = @transform_0, window_bounds = array<i64: 8, 32>}, {transform_indices = @transform_1, window_bounds = array<i64: 1, 1, 32>}, {transform_indices = @transform_2, window_bounds = array<i64: 1, 1, 32>}, {transform_indices = @transform_3, window_bounds = array<i64: 1, 32, 96>}, {transform_indices = @transform_4, window_bounds = array<i64: 1, 1, 96>}, {transform_indices = @transform_5, window_bounds = array<i64: 1, 32, 32>}, {transform_indices = @transform_6, window_bounds = array<i64: 1, 1, 32>}, {transform_indices = @transform_7, window_bounds = array<i64: 1, 1, 32>}, {transform_indices = @transform_8, window_bounds = array<i64: 1, 1, 32>}, {transform_indices = @transform_9, window_bounds = array<i64: 1, 32, 128>}, {transform_indices = @transform_10, window_bounds = array<i64: 1, 1, 128>}, {transform_indices = @transform_11, window_bounds = array<i64: 1, 128, 32>}, {transform_indices = @transform_12, window_bounds = array<i64: 1, 1, 32>}, {pipeline_mode = #tpu.pipeline_mode<synchronous>, transform_indices = @transform_13, window_bounds = array<i64: 1, 32>}, {pipeline_mode = #tpu.pipeline_mode<synchronous>, transform_indices = @transform_14, window_bounds = array<i64: 32, 128>}, {pipeline_mode = #tpu.pipeline_mode<synchronous>, transform_indices = @transform_15, window_bounds = array<i64: 1, 128>}, {transform_indices = @transform_16, window_bounds = array<i64: 8, 128>}]} {
    %c0_i32 = arith.constant 0 : i32
    %0 = arith.cmpi eq, %arg1, %c0_i32 : i32
    %1 = arith.extui %0 : i1 to i32
    %c0_i32_0 = arith.constant 0 : i32
    %2 = arith.cmpi ne, %1, %c0_i32_0 : i32
    scf.if %2 {
      %c0_61 = arith.constant 0 : index
      %c0_62 = arith.constant 0 : index
      %134 = vector.load %arg2[%c0_61, %c0_62] : memref<8x32xf32, #tpu.memory_space<vmem>>, vector<8x32xf32>
      %c0_63 = arith.constant 0 : index
      %c0_64 = arith.constant 0 : index
      %135 = vector.load %arg19[%c0_63, %c0_64] : memref<8x32xf32, #tpu.memory_space<vmem>>, vector<8x32xf32>
      tpu.vector_store %arg19[%c0_63, %c0_64], %134 {strides = array<i32>} : memref<8x32xf32, #tpu.memory_space<vmem>>, vector<8x32xf32>,
    } else {
    }
    %c0 = arith.constant 0 : index
    %c0_1 = arith.constant 0 : index
    %3 = vector.load %arg19[%c0, %c0_1] : memref<8x32xf32, #tpu.memory_space<vmem>>, vector<8x32xf32>
    %4 = tpu.iota {dimensions = array<i32: 0>} : vector<8x8xi32>
    %5 = tpu.iota {dimensions = array<i32: 1>} : vector<8x8xi32>
    %6 = arith.cmpi sle, %5, %4 : vector<8x8xi32>
    %7 = vector.shape_cast %6 : vector<8x8xi1> to vector<1x8x8xi1>
    %c0_2 = arith.constant 0 : index
    %c0_3 = arith.constant 0 : index
    %c0_4 = arith.constant 0 : index
    %8 = vector.load %arg3[%c0_2, %c0_3, %c0_4] : memref<1x1x32xf32, #tpu.memory_space<vmem>>, vector<1x1x32xf32>
    %9 = vector.shape_cast %8 : vector<1x1x32xf32> to vector<1x32xf32>
    %c0_5 = arith.constant 0 : index
    %c0_6 = arith.constant 0 : index
    %c0_7 = arith.constant 0 : index
    %10 = vector.load %arg4[%c0_5, %c0_6, %c0_7] : memref<1x1x32xf32, #tpu.memory_space<vmem>>, vector<1x1x32xf32>
    %11 = vector.shape_cast %10 : vector<1x1x32xf32> to vector<1x32xf32>
    %cst = arith.constant dense<0.000000e+00> : vector<8xf32>
    %12 = vector.multi_reduction <add>, %3, %cst [1] : vector<8x32xf32> to vector<8xf32>
    %13 = vector.shape_cast %12 : vector<8xf32> to vector<8x1xf32>
    %cst_8 = arith.constant 3.200000e+01 : f32
    %14 = vector.broadcast %cst_8 : f32 to vector<8x1xf32>
    %15 = arith.divf %13, %14 : vector<8x1xf32>
    %16 = vector.broadcast %15 : vector<8x1xf32> to vector<8x32xf32>
    %17 = arith.subf %3, %16 : vector<8x32xf32>
    %18 = vector.broadcast %15 : vector<8x1xf32> to vector<8x32xf32>
    %19 = arith.subf %3, %18 : vector<8x32xf32>
    %20 = arith.mulf %17, %19 : vector<8x32xf32>
    %cst_9 = arith.constant dense<0.000000e+00> : vector<8xf32>
    %21 = vector.multi_reduction <add>, %20, %cst_9 [1] : vector<8x32xf32> to vector<8xf32>
    %22 = vector.shape_cast %21 : vector<8xf32> to vector<8x1xf32>
    %cst_10 = arith.constant 3.200000e+01 : f32
    %23 = vector.broadcast %cst_10 : f32 to vector<8x1xf32>
    %24 = arith.divf %22, %23 : vector<8x1xf32>
    %25 = vector.broadcast %15 : vector<8x1xf32> to vector<8x32xf32>
    %26 = arith.subf %3, %25 : vector<8x32xf32>
    %cst_11 = arith.constant 9.99999974E-6 : f32
    %27 = vector.broadcast %cst_11 : f32 to vector<8x1xf32>
    %28 = arith.addf %24, %27 : vector<8x1xf32>
    %29 = math.rsqrt %28 : vector<8x1xf32>
    %30 = vector.broadcast %29 : vector<8x1xf32> to vector<8x32xf32>
    %31 = arith.mulf %26, %30 : vector<8x32xf32>
    %32 = vector.broadcast %9 : vector<1x32xf32> to vector<8x32xf32>
    %33 = arith.mulf %31, %32 : vector<8x32xf32>
    %34 = vector.broadcast %11 : vector<1x32xf32> to vector<8x32xf32>
    %35 = arith.addf %33, %34 : vector<8x32xf32>
    %36 = arith.truncf %35 : vector<8x32xf32> to vector<8x32xbf16>
    %c0_12 = arith.constant 0 : index
    %c0_13 = arith.constant 0 : index
    %c0_14 = arith.constant 0 : index
    %37 = vector.load %arg5[%c0_12, %c0_13, %c0_14] : memref<1x32x96xbf16, #tpu.memory_space<vmem>>, vector<1x32x96xbf16>
    %38 = vector.shape_cast %37 : vector<1x32x96xbf16> to vector<32x96xbf16>
    %cst_15 = arith.constant dense<0.000000e+00> : vector<8x96xf32>
    %39 = tpu.matmul %36, %38, %cst_15 {dimension_numbers = #tpu.dot_dimension_numbers<[1], [0], [0], [1], [0, 0, 1, 1], [], []>} : vector<8x32xbf16>, vector<32x96xbf16>, vector<8x96xf32> -> vector<8x96xf32>
    %c0_16 = arith.constant 0 : index
    %c0_17 = arith.constant 0 : index
    %c0_18 = arith.constant 0 : index
    %40 = vector.load %arg6[%c0_16, %c0_17, %c0_18] : memref<1x1x96xf32, #tpu.memory_space<vmem>>, vector<1x1x96xf32>
    %41 = vector.shape_cast %40 : vector<1x1x96xf32> to vector<1x96xf32>
    %42 = vector.broadcast %41 : vector<1x96xf32> to vector<8x96xf32>
    %43 = arith.addf %39, %42 : vector<8x96xf32>
    %44 = vector.extract_strided_slice %43 {offsets = [0, 0], sizes = [8, 32], strides = [1, 1]} : vector<8x96xf32> to vector<8x32xf32>
    %cst_19 = arith.constant 0.353553385 : f32
    %45 = vector.broadcast %cst_19 : f32 to vector<8x32xf32>
    %46 = arith.mulf %44, %45 : vector<8x32xf32>
    %47 = vector.shape_cast %46 : vector<8x32xf32> to vector<8x4x8xf32>
    %48 = vector.extract_strided_slice %43 {offsets = [0, 32], sizes = [8, 32], strides = [1, 1]} : vector<8x96xf32> to vector<8x32xf32>
    %49 = vector.shape_cast %48 : vector<8x32xf32> to vector<8x4x8xf32>
    %50 = vector.extract_strided_slice %43 {offsets = [0, 64], sizes = [8, 32], strides = [1, 1]} : vector<8x96xf32> to vector<8x32xf32>
    %51 = vector.shape_cast %50 : vector<8x32xf32> to vector<8x4x8xf32>
    %52 = arith.truncf %47 : vector<8x4x8xf32> to vector<8x4x8xbf16>
    %53 = arith.truncf %49 : vector<8x4x8xf32> to vector<8x4x8xbf16>
    "tpu.trace_start"() <{level = 10 : i32, message = "qhd,khd->hqk"}> : () -> ()
    %cst_20 = arith.constant dense<0.000000e+00> : vector<4x8x8xf32>
    %54 = tpu.matmul %52, %53, %cst_20 {dimension_numbers = #tpu.dot_dimension_numbers<[2], [2], [0], [0], [0, 1, 0, 0, 1, 0], [1], [1]>} : vector<8x4x8xbf16>, vector<8x4x8xbf16>, vector<4x8x8xf32> -> vector<4x8x8xf32>
    %cst_21 = arith.constant -1.000000e+30 : f32
    "tpu.trace_stop"() : () -> ()
    %55 = vector.shape_cast %7 : vector<1x8x8xi1> to vector<1x8x8xi1>
    %56 = vector.broadcast %55 : vector<1x8x8xi1> to vector<4x8x8xi1>
    %57 = vector.broadcast %cst_21 : f32 to vector<4x8x8xf32>
    %58 = arith.select %56, %54, %57 : vector<4x8x8xi1>, vector<4x8x8xf32>
    %cst_22 = arith.constant dense<0xFF800000> : vector<4x8xf32>
    %59 = vector.multi_reduction <maximumf>, %58, %cst_22 [2] : vector<4x8x8xf32> to vector<4x8xf32>
    %60 = vector.shape_cast %59 : vector<4x8xf32> to vector<4x8x1xf32>
    %61 = vector.broadcast %60 : vector<4x8x1xf32> to vector<4x8x8xf32>
    %62 = arith.subf %58, %61 : vector<4x8x8xf32>
    %63 = math.exp %62 : vector<4x8x8xf32>
    %cst_23 = arith.constant dense<0.000000e+00> : vector<4x8xf32>
    %64 = vector.multi_reduction <add>, %63, %cst_23 [2] : vector<4x8x8xf32> to vector<4x8xf32>
    %65 = vector.shape_cast %64 : vector<4x8xf32> to vector<4x8x1xf32>
    %66 = tpu.reciprocal %65 {approx = true} : vector<4x8x1xf32> -> vector<4x8x1xf32>
    %67 = vector.broadcast %66 : vector<4x8x1xf32> to vector<4x8x8xf32>
    %68 = arith.mulf %63, %67 : vector<4x8x8xf32>
    %69 = arith.truncf %68 : vector<4x8x8xf32> to vector<4x8x8xbf16>
    %70 = arith.truncf %51 : vector<8x4x8xf32> to vector<8x4x8xbf16>
    "tpu.trace_start"() <{level = 10 : i32, message = "hqk,khd->qhd"}> : () -> ()
    %cst_24 = arith.constant dense<0.000000e+00> : vector<4x8x8xf32>
    %71 = tpu.matmul %70, %69, %cst_24 {dimension_numbers = #tpu.dot_dimension_numbers<[0], [2], [2], [1], [0, 1, 0, 2, 1, 1], [1], [0]>} : vector<8x4x8xbf16>, vector<4x8x8xbf16>, vector<4x8x8xf32> -> vector<4x8x8xf32>
    %72 = tpu.transpose %71, [2, 0, 1] : vector<4x8x8xf32> -> vector<8x4x8xf32>
    "tpu.trace_stop"() : () -> ()
    %73 = vector.shape_cast %72 : vector<8x4x8xf32> to vector<8x32xf32>
    %74 = arith.truncf %73 : vector<8x32xf32> to vector<8x32xbf16>
    %c0_25 = arith.constant 0 : index
    %c0_26 = arith.constant 0 : index
    %c0_27 = arith.constant 0 : index
    %75 = vector.load %arg7[%c0_25, %c0_26, %c0_27] : memref<1x32x32xbf16, #tpu.memory_space<vmem>>, vector<1x32x32xbf16>
    %76 = vector.shape_cast %75 : vector<1x32x32xbf16> to vector<32x32xbf16>
    %cst_28 = arith.constant dense<0.000000e+00> : vector<8x32xf32>
    %77 = tpu.matmul %74, %76, %cst_28 {dimension_numbers = #tpu.dot_dimension_numbers<[1], [0], [0], [1], [0, 0, 1, 1], [], []>} : vector<8x32xbf16>, vector<32x32xbf16>, vector<8x32xf32> -> vector<8x32xf32>
    %c0_29 = arith.constant 0 : index
    %c0_30 = arith.constant 0 : index
    %c0_31 = arith.constant 0 : index
    %78 = vector.load %arg8[%c0_29, %c0_30, %c0_31] : memref<1x1x32xf32, #tpu.memory_space<vmem>>, vector<1x1x32xf32>
    %79 = vector.shape_cast %78 : vector<1x1x32xf32> to vector<1x32xf32>
    %80 = vector.broadcast %79 : vector<1x32xf32> to vector<8x32xf32>
    %81 = arith.addf %77, %80 : vector<8x32xf32>
    %82 = arith.addf %3, %81 : vector<8x32xf32>
    %c0_32 = arith.constant 0 : index
    %c0_33 = arith.constant 0 : index
    %c0_34 = arith.constant 0 : index
    %83 = vector.load %arg9[%c0_32, %c0_33, %c0_34] : memref<1x1x32xf32, #tpu.memory_space<vmem>>, vector<1x1x32xf32>
    %84 = vector.shape_cast %83 : vector<1x1x32xf32> to vector<1x32xf32>
    %c0_35 = arith.constant 0 : index
    %c0_36 = arith.constant 0 : index
    %c0_37 = arith.constant 0 : index
    %85 = vector.load %arg10[%c0_35, %c0_36, %c0_37] : memref<1x1x32xf32, #tpu.memory_space<vmem>>, vector<1x1x32xf32>
    %86 = vector.shape_cast %85 : vector<1x1x32xf32> to vector<1x32xf32>
    %cst_38 = arith.constant dense<0.000000e+00> : vector<8xf32>
    %87 = vector.multi_reduction <add>, %82, %cst_38 [1] : vector<8x32xf32> to vector<8xf32>
    %88 = vector.shape_cast %87 : vector<8xf32> to vector<8x1xf32>
    %cst_39 = arith.constant 3.200000e+01 : f32
    %89 = vector.broadcast %cst_39 : f32 to vector<8x1xf32>
    %90 = arith.divf %88, %89 : vector<8x1xf32>
    %91 = vector.broadcast %90 : vector<8x1xf32> to vector<8x32xf32>
    %92 = arith.subf %82, %91 : vector<8x32xf32>
    %93 = vector.broadcast %90 : vector<8x1xf32> to vector<8x32xf32>
    %94 = arith.subf %82, %93 : vector<8x32xf32>
    %95 = arith.mulf %92, %94 : vector<8x32xf32>
    %cst_40 = arith.constant dense<0.000000e+00> : vector<8xf32>
    %96 = vector.multi_reduction <add>, %95, %cst_40 [1] : vector<8x32xf32> to vector<8xf32>
    %97 = vector.shape_cast %96 : vector<8xf32> to vector<8x1xf32>
    %cst_41 = arith.constant 3.200000e+01 : f32
    %98 = vector.broadcast %cst_41 : f32 to vector<8x1xf32>
    %99 = arith.divf %97, %98 : vector<8x1xf32>
    %100 = vector.broadcast %90 : vector<8x1xf32> to vector<8x32xf32>
    %101 = arith.subf %82, %100 : vector<8x32xf32>
    %cst_42 = arith.constant 9.99999974E-6 : f32
    %102 = vector.broadcast %cst_42 : f32 to vector<8x1xf32>
    %103 = arith.addf %99, %102 : vector<8x1xf32>
    %104 = math.rsqrt %103 : vector<8x1xf32>
    %105 = vector.broadcast %104 : vector<8x1xf32> to vector<8x32xf32>
    %106 = arith.mulf %101, %105 : vector<8x32xf32>
    %107 = vector.broadcast %84 : vector<1x32xf32> to vector<8x32xf32>
    %108 = arith.mulf %106, %107 : vector<8x32xf32>
    %109 = vector.broadcast %86 : vector<1x32xf32> to vector<8x32xf32>
    %110 = arith.addf %108, %109 : vector<8x32xf32>
    %111 = arith.truncf %110 : vector<8x32xf32> to vector<8x32xbf16>
    %c0_43 = arith.constant 0 : index
    %c0_44 = arith.constant 0 : index
    %c0_45 = arith.constant 0 : index
    %112 = vector.load %arg11[%c0_43, %c0_44, %c0_45] : memref<1x32x128xbf16, #tpu.memory_space<vmem>>, vector<1x32x128xbf16>
    %113 = vector.shape_cast %112 : vector<1x32x128xbf16> to vector<32x128xbf16>
    %cst_46 = arith.constant dense<0.000000e+00> : vector<8x128xf32>
    %114 = tpu.matmul %111, %113, %cst_46 {dimension_numbers = #tpu.dot_dimension_numbers<[1], [0], [0], [1], [0, 0, 1, 1], [], []>} : vector<8x32xbf16>, vector<32x128xbf16>, vector<8x128xf32> -> vector<8x128xf32>
    %c0_47 = arith.constant 0 : index
    %c0_48 = arith.constant 0 : index
    %c0_49 = arith.constant 0 : index
    %115 = vector.load %arg12[%c0_47, %c0_48, %c0_49] : memref<1x1x128xf32, #tpu.memory_space<vmem>>, vector<1x1x128xf32>
    %116 = vector.shape_cast %115 : vector<1x1x128xf32> to vector<1x128xf32>
    %117 = vector.broadcast %116 : vector<1x128xf32> to vector<8x128xf32>
    %118 = arith.addf %114, %117 : vector<8x128xf32>
    %cst_50 = arith.constant 0.000000e+00 : f32
    %119 = vector.broadcast %cst_50 : f32 to vector<8x128xf32>
    %120 = arith.maximumf %118, %119 : vector<8x128xf32>
    %121 = arith.truncf %120 : vector<8x128xf32> to vector<8x128xbf16>
    %c0_51 = arith.constant 0 : index
    %c0_52 = arith.constant 0 : index
    %c0_53 = arith.constant 0 : index
    %122 = vector.load %arg13[%c0_51, %c0_52, %c0_53] : memref<1x128x32xbf16, #tpu.memory_space<vmem>>, vector<1x128x32xbf16>
    %123 = vector.shape_cast %122 : vector<1x128x32xbf16> to vector<128x32xbf16>
    %cst_54 = arith.constant dense<0.000000e+00> : vector<8x32xf32>
    %124 = tpu.matmul %121, %123, %cst_54 {dimension_numbers = #tpu.dot_dimension_numbers<[1], [0], [0], [1], [0, 0, 1, 1], [], []>} : vector<8x128xbf16>, vector<128x32xbf16>, vector<8x32xf32> -> vector<8x32xf32>
    %c0_55 = arith.constant 0 : index
    %c0_56 = arith.constant 0 : index
    %c0_57 = arith.constant 0 : index
    %125 = vector.load %arg14[%c0_55, %c0_56, %c0_57] : memref<1x1x32xf32, #tpu.memory_space<vmem>>, vector<1x1x32xf32>
    %126 = vector.shape_cast %125 : vector<1x1x32xf32> to vector<1x32xf32>
    %127 = vector.broadcast %126 : vector<1x32xf32> to vector<8x32xf32>
    %128 = arith.addf %124, %127 : vector<8x32xf32>
    %129 = arith.addf %82, %128 : vector<8x32xf32>
    %c0_58 = arith.constant 0 : index
    %c0_59 = arith.constant 0 : index
    %130 = vector.load %arg19[%c0_58, %c0_59] : memref<8x32xf32, #tpu.memory_space<vmem>>, vector<8x32xf32>
    tpu.vector_store %arg19[%c0_58, %c0_59], %129 {strides = array<i32>} : memref<8x32xf32, #tpu.memory_space<vmem>>, vector<8x32xf32>,
    %c1_i32 = arith.constant 1 : i32
    %131 = arith.cmpi eq, %arg1, %c1_i32 : i32
    %132 = arith.extui %131 : i1 to i32
    %c0_i32_60 = arith.constant 0 : i32
    %133 = arith.cmpi ne, %132, %c0_i32_60 : i32
    scf.if %133 {
      %134 = arith.mulf %129, %129 : vector<8x32xf32>
      %cst_61 = arith.constant dense<0.000000e+00> : vector<8xf32>
      %135 = vector.multi_reduction <add>, %134, %cst_61 [1] : vector<8x32xf32> to vector<8xf32>
      %136 = vector.shape_cast %135 : vector<8xf32> to vector<8x1xf32>
      %cst_62 = arith.constant 3.200000e+01 : f32
      %137 = vector.broadcast %cst_62 : f32 to vector<8x1xf32>
      %138 = arith.divf %136, %137 : vector<8x1xf32>
      %cst_63 = arith.constant 9.99999997E-7 : f32
      %139 = vector.broadcast %cst_63 : f32 to vector<8x1xf32>
      %140 = arith.addf %138, %139 : vector<8x1xf32>
      %141 = math.rsqrt %140 : vector<8x1xf32>
      %142 = vector.broadcast %141 : vector<8x1xf32> to vector<8x32xf32>
      %143 = arith.mulf %129, %142 : vector<8x32xf32>
      %c0_64 = arith.constant 0 : index
      %c0_65 = arith.constant 0 : index
      %144 = vector.load %arg15[%c0_64, %c0_65] : memref<1x32xf32, #tpu.memory_space<vmem>>, vector<1x32xf32>
      %145 = vector.broadcast %144 : vector<1x32xf32> to vector<8x32xf32>
      %146 = arith.mulf %143, %145 : vector<8x32xf32>
      %147 = arith.truncf %146 : vector<8x32xf32> to vector<8x32xbf16>
      %c0_66 = arith.constant 0 : index
      %c0_67 = arith.constant 0 : index
      %148 = vector.load %arg16[%c0_66, %c0_67] : memref<32x128xbf16, #tpu.memory_space<vmem>>, vector<32x128xbf16>
      %cst_68 = arith.constant dense<0.000000e+00> : vector<8x128xf32>
      %149 = tpu.matmul %147, %148, %cst_68 {dimension_numbers = #tpu.dot_dimension_numbers<[1], [0], [0], [1], [0, 0, 1, 1], [], []>} : vector<8x32xbf16>, vector<32x128xbf16>, vector<8x128xf32> -> vector<8x128xf32>
      %c0_69 = arith.constant 0 : index
      %c0_70 = arith.constant 0 : index
      %150 = vector.load %arg17[%c0_69, %c0_70] : memref<1x128xf32, #tpu.memory_space<vmem>>, vector<1x128xf32>
      %151 = vector.broadcast %150 : vector<1x128xf32> to vector<8x128xf32>
      %152 = arith.addf %149, %151 : vector<8x128xf32>
      %c0_71 = arith.constant 0 : index
      %c0_72 = arith.constant 0 : index
      %153 = vector.load %arg18[%c0_71, %c0_72] : memref<8x128xf32, #tpu.memory_space<vmem>>, vector<8x128xf32>
      tpu.vector_store %arg18[%c0_71, %c0_72], %152 {strides = array<i32>} : memref<8x128xf32, #tpu.memory_space<vmem>>, vector<8x128xf32>,
    } else {
    }
    return
  }
  func.func @transform_0(%arg0: i32, %arg1: i32) -> (i32, i32) {
    %c0_i32 = arith.constant 0 : i32
    %c0_i32_0 = arith.constant 0 : i32
    return %arg0, %c0_i32 : i32, i32
  }
  func.func @transform_1(%arg0: i32, %arg1: i32) -> (i32, i32, i32) {
    %c0_i32 = arith.constant 0 : i32
    %c0_i32_0 = arith.constant 0 : i32
    %c0_i32_1 = arith.constant 0 : i32
    return %arg1, %c0_i32, %c0_i32_0 : i32, i32, i32
  }
  func.func @transform_2(%arg0: i32, %arg1: i32) -> (i32, i32, i32) {
    %c0_i32 = arith.constant 0 : i32
    %c0_i32_0 = arith.constant 0 : i32
    %c0_i32_1 = arith.constant 0 : i32
    return %arg1, %c0_i32, %c0_i32_0 : i32, i32, i32
  }
  func.func @transform_3(%arg0: i32, %arg1: i32) -> (i32, i32, i32) {
    %c0_i32 = arith.constant 0 : i32
    %c0_i32_0 = arith.constant 0 : i32
    %c0_i32_1 = arith.constant 0 : i32
    return %arg1, %c0_i32, %c0_i32_0 : i32, i32, i32
  }
  func.func @transform_4(%arg0: i32, %arg1: i32) -> (i32, i32, i32) {
    %c0_i32 = arith.constant 0 : i32
    %c0_i32_0 = arith.constant 0 : i32
    %c0_i32_1 = arith.constant 0 : i32
    return %arg1, %c0_i32, %c0_i32_0 : i32, i32, i32
  }
  func.func @transform_5(%arg0: i32, %arg1: i32) -> (i32, i32, i32) {
    %c0_i32 = arith.constant 0 : i32
    %c0_i32_0 = arith.constant 0 : i32
    %c0_i32_1 = arith.constant 0 : i32
    return %arg1, %c0_i32, %c0_i32_0 : i32, i32, i32
  }
  func.func @transform_6(%arg0: i32, %arg1: i32) -> (i32, i32, i32) {
    %c0_i32 = arith.constant 0 : i32
    %c0_i32_0 = arith.constant 0 : i32
    %c0_i32_1 = arith.constant 0 : i32
    return %arg1, %c0_i32, %c0_i32_0 : i32, i32, i32
  }
  func.func @transform_7(%arg0: i32, %arg1: i32) -> (i32, i32, i32) {
    %c0_i32 = arith.constant 0 : i32
    %c0_i32_0 = arith.constant 0 : i32
    %c0_i32_1 = arith.constant 0 : i32
    return %arg1, %c0_i32, %c0_i32_0 : i32, i32, i32
  }
  func.func @transform_8(%arg0: i32, %arg1: i32) -> (i32, i32, i32) {
    %c0_i32 = arith.constant 0 : i32
    %c0_i32_0 = arith.constant 0 : i32
    %c0_i32_1 = arith.constant 0 : i32
    return %arg1, %c0_i32, %c0_i32_0 : i32, i32, i32
  }
  func.func @transform_9(%arg0: i32, %arg1: i32) -> (i32, i32, i32) {
    %c0_i32 = arith.constant 0 : i32
    %c0_i32_0 = arith.constant 0 : i32
    %c0_i32_1 = arith.constant 0 : i32
    return %arg1, %c0_i32, %c0_i32_0 : i32, i32, i32
  }
  func.func @transform_10(%arg0: i32, %arg1: i32) -> (i32, i32, i32) {
    %c0_i32 = arith.constant 0 : i32
    %c0_i32_0 = arith.constant 0 : i32
    %c0_i32_1 = arith.constant 0 : i32
    return %arg1, %c0_i32, %c0_i32_0 : i32, i32, i32
  }
  func.func @transform_11(%arg0: i32, %arg1: i32) -> (i32, i32, i32) {
    %c0_i32 = arith.constant 0 : i32
    %c0_i32_0 = arith.constant 0 : i32
    %c0_i32_1 = arith.constant 0 : i32
    return %arg1, %c0_i32, %c0_i32_0 : i32, i32, i32
  }
  func.func @transform_12(%arg0: i32, %arg1: i32) -> (i32, i32, i32) {
    %c0_i32 = arith.constant 0 : i32
    %c0_i32_0 = arith.constant 0 : i32
    %c0_i32_1 = arith.constant 0 : i32
    return %arg1, %c0_i32, %c0_i32_0 : i32, i32, i32
  }
  func.func @transform_13(%arg0: i32, %arg1: i32) -> (i32, i32) {
    %c0_i32 = arith.constant 0 : i32
    %c0_i32_0 = arith.constant 0 : i32
    %c0_i32_1 = arith.constant 0 : i32
    return %c0_i32, %c0_i32_0 : i32, i32
  }
  func.func @transform_14(%arg0: i32, %arg1: i32) -> (i32, i32) {
    %c0_i32 = arith.constant 0 : i32
    %c0_i32_0 = arith.constant 0 : i32
    %c0_i32_1 = arith.constant 0 : i32
    return %c0_i32, %c0_i32_0 : i32, i32
  }
  func.func @transform_15(%arg0: i32, %arg1: i32) -> (i32, i32) {
    %c0_i32 = arith.constant 0 : i32
    %c0_i32_0 = arith.constant 0 : i32
    %c0_i32_1 = arith.constant 0 : i32
    return %c0_i32, %c0_i32_0 : i32, i32
  }
  func.func @transform_16(%arg0: i32, %arg1: i32) -> (i32, i32) {
    %c0_i32 = arith.constant 0 : i32
    %c0_i32_0 = arith.constant 0 : i32
    return %arg0, %c0_i32 : i32, i32
  }
}

</mosaic_0001>

<bundles_post_ra>
// kernel: tpu_custom_call.1
= control target key start
LH: loop header
LB: loop body
LE: loop exit
PB: predicated region body
PF: predicated region fallthrough
CT: control target
= control target key end

     0   :  { %s4322_s0 = inlined_call_operand.vmem [shape: f32[16,32], index: 0, kind: input, shape index: {}]   ;;  %s4323_s1 = inlined_call_operand.vmem [shape: f32[2,1,32], index: 1, kind: input, shape index: {}]   ;;  %s4324_s2 = inlined_call_operand.vmem [shape: f32[2,1,32], index: 2, kind: input, shape index: {}]   ;;  %s4325_s3 = inlined_call_operand.vmem [shape: bf16[2,32,96], index: 3, kind: input, shape index: {}]   ;;  %s4326_s4 = inlined_call_operand.vmem [shape: f32[2,1,96], index: 4, kind: input, shape index: {}]   ;;  %s4327_s5 = inlined_call_operand.vmem [shape: bf16[2,32,32], index: 5, kind: input, shape index: {}]   ;;  %s4328_s6 = inlined_call_operand.vmem [shape: f32[2,1,32], index: 6, kind: input, shape index: {}]   ;;  %s4329_s7 = inlined_call_operand.vmem [shape: f32[2,1,32], index: 7, kind: input, shape index: {}]   ;;  %s4330_s8 = inlined_call_operand.vmem [shape: f32[2,1,32], index: 8, kind: input, shape index: {}]   ;;  %s4331_s9 = inlined_call_operand.vmem [shape: bf16[2,32,128], index: 9, kind: input, shape index: {}]   ;;  %s4332_s10 = inlined_call_operand.vmem [shape: f32[2,1,128], index: 10, kind: input, shape index: {}]   ;;  %s4333_s11 = inlined_call_operand.vmem [shape: bf16[2,128,32], index: 11, kind: input, shape index: {}]   ;;  %s4334_s12 = inlined_call_operand.vmem [shape: f32[2,1,32], index: 12, kind: input, shape index: {}]   ;;  %s4335_s13 = inlined_call_operand.vmem [shape: f32[1,32], index: 13, kind: input, shape index: {}]   ;;  %s4336_s14 = inlined_call_operand.vmem [shape: bf16[32,128], index: 14, kind: input, shape index: {}]   ;;  %s4337_s15 = inlined_call_operand.vmem [shape: f32[1,128], index: 15, kind: input, shape index: {}]   ;;  %s4338_s16 = inlined_call_operand.hbm [shape: f32[16,128], index: 16, kind: output, shape index: {}]  }
   0x1   :  { %4355 = sst [smem:[#allocation19_spill]] %s4322_s0 }
   0x2   :  { %4356 = sst [smem:[#allocation20_spill]] %s4324_s2 }
   0x3   :  { %4357 = sst [smem:[#allocation21_spill]] %s4325_s3 }
   0x4   :  { %4358 = sst [smem:[#allocation22_spill]] %s4327_s5 }
   0x5   :  { %4359 = sst [smem:[#allocation23_spill]] %s4335_s13 }
   0x6   :  { %4360 = sst [smem:[#allocation24_spill]] %s4336_s14 }
   0x7   :  { %4361 = sst [smem:[#allocation25_spill]] %s4337_s15 }
   0x8   :  { %4362 = sst [smem:[#allocation26_spill]] %s4338_s16 }
   0x9   :  { %21 = vsyncpa [#allocation4], 0 }
   0xa   :  { %23 = vsyncpa [#allocation4 + $0x1], 0  ;;  %s3805_s21 = smov 0   ;;  %s3807_s22 = smov 0  }
   0xb   :  { %s3809_s23 = smov 0   ;;  %s3811_s24 = smov 0  }
   0xc   :  { %s3813_s25 = smov 0   ;;  %s3815_s26 = smov 0  }
   0xd   :  { %s3817_s27 = smov 0   ;;  %s3819_s28 = smov 0  }
   0xe LB: > { %4363 = sst [smem:[#allocation6_spill]] %s3674_s21  ;;  %s3277_s29 = sadd.s32 4294967295, %s3702_s28   ;;  %s3702_s28 = sphi %s3819_s28, %s29_s28   ;;  %s3698_s27 = sphi %s3817_s27, %s4408_s27   ;;  %s3694_s26 = sphi %s3815_s26, %s4407_s26   ;;  %s3690_s25 = sphi %s3813_s25, %s4406_s25   ;;  %s3686_s24 = sphi %s3811_s24, %s4405_s24   ;;  %s3682_s23 = sphi %s3809_s23, %s4404_s23   ;;  %s3678_s22 = sphi %s3807_s22, %s4403_s22   ;;  %s3674_s21 = sphi %s3805_s21, %s4402_s21  }
   0xf   : > { %4364 = sst [smem:[#allocation7_spill]] %s3678_s22  ;;  %s3278_s30 = sadd.s32 4294967294, %s3702_s28  }
  0x10   : > { %4365 = sst [smem:[#allocation8_spill]] %s3682_s23  ;;  %s38_s0 = sadd.s32 1, %s3694_s26 }
  0x11   : > { %4366 = sst [smem:[#allocation9_spill]] %s3686_s24  ;;  %p39_p0 = scmp.ge.s32.totalorder %s38_s0, 2 }
  0x12   : > { %4367 = sst [smem:[#allocation10_spill]] %s3690_s25  ;;  %s41_s17 = sadd.s32 1, %s3698_s27 }
  0x13   : > { %4368 = sst [smem:[#allocation11_spill]] %s3694_s26  ;;  %p459_p1 = scmp.ne.s32.totalorder %s3682_s23, %s3678_s22 }
  0x14   : > { %4369 = sst [smem:[#allocation12_spill]] %s3698_s27  ;;  %p460_p2 = scmp.eq.s32.totalorder %s3277_s29, 3 }
  0x15   : > { %4370 = sst [smem:[#allocation13_spill]] %s3702_s28  ;;  %s4410_s0 = smov (%p39_p0, %s38_s0), 0 }
  0x16   : > { %4371 = sst [smem:[#allocation14_spill]] %s4410_s0  ;;  %s4412_s17 = smov (!%p39_p0, %s41_s17), %s3698_s27 }
  0x17   : > { %p3854_p3 = por %p460_p2, %p459_p1  ;;  %p465_p4 = scmp.ne.s32.totalorder %s3678_s22, %s3674_s21 }
  0x18   : > { %p43_p5 = scmp.ge.s32.totalorder %s4412_s17, 2  ;;  %p466_p6 = scmp.eq.s32.totalorder %s3278_s30, 3 }
  0x19   : > { %s4372_s18 = scalar_select %p3854_p3, 1, 0 }
  0x1a   : > { %p3281_p7 = scmp.ge.s32.totalorder %s3702_s28, 1  ;;  %p580_p8 = scmp.lt.s32.totalorder %s3702_s28, 5 }
  0x1b   : > { %4373 = sst [smem:[#allocation15_spill]] %s4372_s18  ;;  %s4414_s17 = smov (%p43_p5, %s4412_s17), 0 }
  0x1c   : > { %4374 = sst [smem:[#allocation16_spill]] %s4414_s17  ;;  %p3864_p9 = por %p466_p6, %p465_p4 }
  0x1d   : > { %p581_p10 = pnand %p3281_p7, %p580_p8  ;;  %s446_s20 = ssub.s32 %s3698_s27, %s4414_s17 }
  0x1e   : > { %s4375_s19 = scalar_select %p3864_p9, 1, 0 }
  0x1f   : > { %s449_s29 = sadd.s32 1, %s3682_s23  ;;  %p447_p11 = scmp.eq.s32.totalorder %s446_s20, 0 }
  0x20   : > { %4376 = sst [smem:[#allocation17_spill]] %s4375_s19  ;;  %584 = sbr.rel (%p581_p10) target bundleno = 3586 (0xe02), region = 84 }
  0x21   : > { %s3872_s0 = scalar_select %p447_p11, %s3682_s23, %s449_s29  }
  0x22   : > { %s4344_s30 = sand.u32 (!%p581_p10), 1, %s3678_s22   ;;  %p673_p12 = scmp.lt.s32.totalorder (!%p581_p10), %s3690_s25, 1 }
  0x23   : > { %4377 = sst [smem:[#allocation18_spill]] %s3872_s0  ;;  %s3878_s26 = sshll.u32 (!%p581_p10), %s4344_s30, 3 }
  0x24   : > { %p677_p13 = scmp.lt.s32.totalorder (!%p581_p10), %s3686_s24, 1  ;;  %s4378_s27 = sld [smem:[#allocation19_spill]] (!%p581_p10) }
  0x25   : > { %s4380_s3 = sld [smem:[#allocation21_spill]] (!%p581_p10)  ;;  %s4381_s5 = sld [smem:[#allocation22_spill]] (!%p581_p10) }
  0x26   : > { %s672_s13 = scalar_lea.vmem (!%p581_p10), [#allocation3], %s3878_s26  ;;  %s4382_s15 = sld [smem:[#allocation9_spill]] (!%p581_p10) }
  0x27   : > { %s674_s19 = scalar_select %p673_p12, %s3690_s25, 1 }
  0x28   : > { %s3883_s21 = scalar_select %p677_p13, %s3686_s24, 1 }
  0x29   : > { %s3283_s20 = sshll.u32 %s674_s19, 3 }
  0x2a   : > { %s676_s30 = scalar_lea.vmem %s4378_s27, %s3283_s20  ;;  %s3342_s25 = sshll.u32 %s3883_s21, 4 }
  0x2b   : > { %s3900_s14 = scalar_lea.vmem %s4380_s3, %s3342_s25  ;;  %s3909_s20 = scalar_lea.vmem %s4381_s5, %s3342_s25 }
  0x2c   : > { %s704_s3 = scalar_lea.vmem %s4330_s8, %s3883_s21  ;;  %s3926_s19 = scalar_lea.vmem %s4331_s9, %s3342_s25 }
  0x2d   : > { %s712_s17 = scalar_lea.vmem %s4332_s10, %s3883_s21  ;;  %s3345_s5 = sshll.u32 %s3883_s21, 6 }
  0x2e   : > { %s720_s16 = scalar_lea.vmem %s4334_s12, %s3883_s21  ;;  %s3940_s28 = scalar_lea.vmem %s4333_s11, %s3345_s5 }
  0x2f   : > { %p3292_p0 = scmp.ne.s32.totalorder %s4382_s15, 0 }
  0x30   : > { %v726_v0 = vld [vmem:[%s676_s30] sm:$0xff] (!%p3292_p0)  ;;  %vm727_vm0 = vcmask (!%p3292_p0), 261120  }
  0x31   : > { %725 = sbr.rel (%p3292_p0) target bundleno = 56 (0x38), region = 88  ;;  %728 = vst.msk [vmem:[#allocation2] sm:$0xff] (!%p3292_p0), %vm727_vm0, %v726_v0 }
  0x38 PF: > { %v729_v1 = vld [vmem:[#allocation2] sm:$0xff]  ;;  %vm737_vm1 = vcmask 261120   ;;  %v3704_v9 = vmov 0.0   ;;  %vm3705_vm2 = vmmov 0   ;;  %v3570_v10 = vld [vmem:[%s3900_s14 + $0x8] sm:$0xff]   ;;  %s4384_s24 = sld [smem:[#allocation20_spill]]  ;;  %s4386_s0 = scalar_lea.vmem %s4326_s4, %s3883_s21  ;;  %v730_v31 = vlaneseq }
  0x39   : > { %v738_v2 = vsel %vm737_vm1, %v729_v1, 0.0  ;;  %v3569_v8 = vld [vmem:[%s3900_s14] sm:$0xff]   ;;  %3383 = vmatprep.subr.bf16.mxu1 %v3704_v9  ;;  %3387 = vmatprep.mubr.msk.bf16.mxu1 %vm3705_vm2, %v3704_v9  ;;  %s4383_s14 = scalar_lea.vmem %s4323_s1, %s3883_s21  ;;  %s3706_s22 = smov 104   ;;  %v3710_v32 = vmov 1983009808   ;;  %vm1579_vm3 = vcmask 1043456  }
  0x3a   : > { %739 = vadd.xlane.f32.xlu0 %v738_v2  ;;  %3384 = vmatpush3.bf16.msra.mxu1 %v3569_v8  ;;  %v3293_v15 = vld [vmem:[%s4383_s14] ss:$0 sm:$0xff]  ;;  %s3707_s18 = smov 120   ;;  %s3708_s15 = smov 112   ;;  %v847_v33 = vunpack.c.l.s4 %v3710_v32  ;;  %v3993_v35 = vshrl.u32 %v730_v31, 7  ;;  %vm1575_vm4 = vcmask 64512  }
  0x3b   : > { %3403 = vmatprep.subr.bf16.mxu0 %v3704_v9  ;;  %3385 = vmatprep.subr.bf16.mxu1 %v3704_v9  ;;  %v3295_v21 = vld [vmem:[%s4386_s0] ss:$0 sm:$0xff]  ;;  %s3709_s2 = smov 96   ;;  %v3711_v37 = vmov 1934713408   ;;  %s3713_s5 = smov 64  }
  0x3c   : > { %3405 = vmatprep.mubr.msk.bf16.mxu0 %vm3705_vm2, %v3704_v9  ;;  %v848_v36 = vunpack.c.0.s8 %v847_v33  ;;  %v879_v38 = vunpack.c.l.s4 %v3711_v37  ;;  %s3715_s14 = smov 8   ;;  %s3716_s25 = smov 24   ;;  %vm2702_vm6 = vcmask 130048   ;;  %vm2704_vm7 = vcmask 195584  }
  0x3d   : > { %s4388_s23 = scalar_lea.vmem %s4329_s7, %s3883_s21 }
  0x3e   : > { %3386 = vmatpush3.bf16.msra.mxu1 %v3570_v10  ;;  %s4385_s29 = scalar_lea.vmem %s4384_s24, %s3883_s21  ;;  %v3996_v40 = vsub.s32 %v848_v36, %v3993_v35  ;;  %v880_v42 = vunpack.c.0.s8 %v879_v38 }
  0x3f   : > { %3391 = vmatprep.subr.bf16.mxu1 %v3704_v9  ;;  %v3294_v17 = vld [vmem:[%s4385_s29] ss:$0 sm:$0xff]  ;;  %s4387_s29 = scalar_lea.vmem %s4328_s6, %s3883_s21 }
  0x40   : > { %v4002_v50 = vsub.s32 %v880_v42, %v3993_v35 }
  0xc7   : > { %v740_v3 = vpop.xlane.xlu0 %739 }
  0xc8   : > { %v742_v4 = vmul.f32 0.03125, %v740_v3 }
  0xca   : > { %v743_v5 = vsub.f32 %v729_v1, %v742_v4 }
  0xcc   : > { %v744_v6 = vmul.f32 %v743_v5, %v743_v5 }
  0xce   : > { %v745_v7 = vsel %vm737_vm1, %v744_v6, 0.0 }
  0xcf   : > { %746 = vadd.xlane.f32.xlu0 %v745_v7 }
 0x15c   : > { %v747_v11 = vpop.xlane.xlu0 %746 }
 0x15d   : > { %v748_v12 = vmul.f32 0.03125, %v747_v11 }
 0x15f   : > { %v749_v13 = vadd.f32 1e-05, %v748_v12 }
 0x161   : > { %3583 = vrsqrt.f32 %v749_v13 }
 0x16b   : > { %v3584_v14 = vpop.eup %3583 }
 0x16c   : > { %v751_v16 = vmul.f32 %v3584_v14, %v743_v5 }
 0x16e   : > { %v758_v18 = vmul.f32 %v3293_v15, %v751_v16 }
 0x170   : > { %v765_v19 = vadd.f32 %v3294_v17, %v758_v18 }
 0x172   : > { %v766_v20 = vpack.c.bf16 %v765_v19, %v765_v19 }
 0x174   : > { %3388 = vmatmul.mubr.msk.bf16.vlgmr.msra.gmra.mrb[0].mxu1 %vm737_vm1, %v766_v20 }
 0x175   : > { %3393 = vmatprep.mubr.msk.bf16.mxu1 %vm3705_vm2, %v3704_v9 }
 0x247   : > { %v827_v22 = vpop.f32.mrb[0].mxu1 }
 0x248   : > { %v3974_v23 = vadd.f32 %v3295_v21, %v827_v22  ;;  %v3389_v24 = vpop.f32.mrb[1].mxu1 }
 0x249   : > { %v830_v25 = vpop.f32.mrb[2].mxu1 }
 0x24a   : > { %917 = vrot.lane.b32.xlu0 %v3974_v23, %s3706_s22  ;;  %913 = vrot.lane.b32.xlu1 %v3974_v23, %s3707_s18  ;;  %v3390_v26 = vpop.f32.mrb[3].mxu1  ;;  %v4014_v8 = vmul.f32 0.35355338, %v3974_v23 }
 0x24e   : > { %915 = vrot.lane.b32.xlu1 %v3974_v23, %s3708_s15 }
 0x252   : > { %919 = vrot.lane.b32.xlu1 %v3974_v23, %s3709_s2 }
 0x2bc   : > { %v3983_v27 = vpop.permute.xlu1 %913  ;;  %v3989_v29 = vpop.permute.xlu0 %917 }
 0x2bd   : > { %921 = vrot.lane.b32.xlu1 %v3983_v27, %s3709_s2 }
 0x2c0   : > { %v3986_v28 = vpop.permute.xlu1 %915 }
 0x2c1   : > { %923 = vrot.lane.b32.xlu1 %v3986_v28, %s3709_s2 }
 0x2c4   : > { %v920_v30 = vpop.permute.xlu1 %919 }
 0x2c5   : > { %925 = vrot.lane.b32.xlu1 %v3989_v29, %s3709_s2 }
 0x32f   : > { %v922_v34 = vpop.permute.xlu1 %921 }
 0x333   : > { %v924_v39 = vpop.permute.xlu1 %923 }
 0x334   : > { %v931_v41 = vcombine.low %v920_v30, %v924_v39  ;;  %v932_v44 = vcombine.high %v920_v30, %v924_v39 }
 0x336   : > { %v939_v47 = vrot.slane %v931_v41, %v3996_v40  ;;  %v946_v51 = vrot.slane %v932_v44, %v3996_v40 }
 0x337   : > { %v926_v43 = vpop.permute.xlu1 %925 }
 0x338   : > { %v947_v45 = vcombine.low %v922_v34, %v926_v43  ;;  %v948_v46 = vcombine.high %v922_v34, %v926_v43 }
 0x33a   : > { %v955_v48 = vrot.slane %v947_v45, %v3996_v40  ;;  %v962_v49 = vrot.slane %v948_v46, %v3996_v40  ;;  %v3712_v45 = vmov 0  }
 0x33c   : > { %v963_v52 = vcombine.low %v939_v47, %v955_v48  ;;  %v964_v53 = vcombine.high %v939_v47, %v955_v48  ;;  %v979_v56 = vcombine.low %v946_v51, %v962_v49  ;;  %v980_v62 = vcombine.high %v946_v51, %v962_v49 }
 0x33e   : > { %v971_v54 = vrot.slane %v963_v52, %v4002_v50  ;;  %v978_v55 = vrot.slane %v964_v53, %v4002_v50  ;;  %v987_v61 = vrot.slane %v979_v56, %v4002_v50  ;;  %v994_v2 = vrot.slane %v980_v62, %v4002_v50 }
 0x340   : > { %v1087_v57 = vpack.c.bf16 %v971_v54, %v971_v54  ;;  %v995_v58 = vcombine.high %v971_v54, %v3704_v9  ;;  %v996_v60 = vcombine.high %v978_v55, %v3704_v9  ;;  %v1089_v63 = vpack.c.bf16 %v978_v55, %v978_v55 }
 0x341   : > { %v997_v1 = vcombine.high %v987_v61, %v3704_v9  ;;  %v1091_v3 = vpack.c.bf16 %v987_v61, %v987_v61  ;;  %v998_v5 = vcombine.high %v994_v2, %v3704_v9  ;;  %v1093_v6 = vpack.c.bf16 %v994_v2, %v994_v2 }
 0x342   : > { %1157 = vxpose.xlu1.c.b16.start.end [1/1] (short) (narrow) %v1087_v57, 16  ;;  %v1088_v59 = vpack.c.bf16 %v995_v58, %v995_v58  ;;  %v1090_v0 = vpack.c.bf16 %v996_v60, %v996_v60 }
 0x343   : > { %v1092_v4 = vpack.c.bf16 %v997_v1, %v997_v1  ;;  %v1094_v7 = vpack.c.bf16 %v998_v5, %v998_v5 }
 0x344   : > { %1173 = vxpose.xlu0.c.b16.start.end [1/1] (short) (narrow) %v1088_v59, 16 }
 0x346   : > { %1189 = vxpose.xlu1.c.b16.start.end [1/1] (short) (narrow) %v1089_v63, 16 }
 0x348   : > { %1205 = vxpose.xlu0.c.b16.start.end [1/1] (short) (narrow) %v1090_v0, 16 }
 0x34a   : > { %1221 = vxpose.xlu1.c.b16.start.end [1/1] (short) (narrow) %v1091_v3, 16 }
 0x34c   : > { %1237 = vxpose.xlu0.c.b16.start.end [1/1] (short) (narrow) %v1092_v4, 16 }
 0x34e   : > { %1253 = vxpose.xlu1.c.b16.start.end [1/1] (short) (narrow) %v1093_v6, 16 }
 0x350   : > { %1269 = vxpose.xlu0.c.b16.start.end [1/1] (short) (narrow) %v1094_v7, 16 }
 0x352   : > { %835 = vrot.lane.b32.xlu1 %v4014_v8, %s3707_s18 }
 0x356   : > { %841 = vrot.lane.b32.xlu1 %v4014_v8, %s3706_s22 }
 0x359   : > { %838 = vrot.lane.b32.xlu0 %v4014_v8, %s3708_s15 }
 0x3a8   : > { %v1165_v10 = vpop.trf.xlu1 }
 0x3aa   : > { %v1181_v11 = vpop.trf.xlu0 }
 0x3ac   : > { %v1197_v12 = vpop.trf.xlu1 }
 0x3ae   : > { %v1213_v13 = vpop.trf.xlu0 }
 0x3b0   : > { %v1229_v14 = vpop.trf.xlu1 }
 0x3b1   : > { %v1285_v16 = vcombine.low %v1165_v10, %v1229_v14 }
 0x3b2   : > { %v1245_v15 = vpop.trf.xlu0 }
 0x3b3   : > { %v1319_v18 = vcombine.low %v1181_v11, %v1245_v15  ;;  %v1292_v21 = vrot.slane %v1285_v16, %v3996_v40 }
 0x3b4   : > { %v1261_v17 = vpop.trf.xlu1 }
 0x3b5   : > { %v1293_v19 = vcombine.low %v1197_v12, %v1261_v17  ;;  %v1326_v25 = vrot.slane %v1319_v18, %v3996_v40 }
 0x3b6   : > { %v1277_v20 = vpop.trf.xlu0 }
 0x3b7   : > { %v1300_v22 = vrot.slane %v1293_v19, %v3996_v40  ;;  %v1327_v24 = vcombine.low %v1213_v13, %v1277_v20 }
 0x3b9   : > { %v1301_v26 = vcombine.low %v1292_v21, %v1300_v22  ;;  %v1302_v30 = vcombine.high %v1292_v21, %v1300_v22  ;;  %v1334_v32 = vrot.slane %v1327_v24, %v3996_v40 }
 0x3bb   : > { %v1335_v33 = vcombine.low %v1326_v25, %v1334_v32  ;;  %v1336_v34 = vcombine.high %v1326_v25, %v1334_v32  ;;  %v1309_v36 = vrot.slane %v1301_v26, %v4002_v50  ;;  %v1316_v37 = vrot.slane %v1302_v30, %v4002_v50 }
 0x3bd   : > { %v1343_v38 = vrot.slane %v1335_v33, %v4002_v50  ;;  %v1350_v39 = vrot.slane %v1336_v34, %v4002_v50  ;;  %v1357_v47 = vshrl.u32 %v1309_v36, 16  ;;  %v1373_v48 = vshrl.u32 %v1316_v37, 16 }
 0x3be   : > { %v1317_v49 = vcombine.high %v1309_v36, %v3712_v45  ;;  %v1318_v56 = vcombine.high %v1316_v37, %v3712_v45 }
 0x3bf   : > { %v1371_v41 = vpack.i.b16 %v1350_v39, %v1316_v37  ;;  %v1355_v42 = vpack.i.b16 %v1343_v38, %v1309_v36  ;;  %v1358_v43 = vshrl.u32 %v1343_v38, 16  ;;  %v1374_v44 = vshrl.u32 %v1350_v39, 16 }
 0x3c0   : > { %v1351_v46 = vcombine.high %v1343_v38, %v3712_v45  ;;  %v1352_v54 = vcombine.high %v1350_v39, %v3712_v45  ;;  %v1365_v55 = vshrl.u32 %v1317_v49, 16  ;;  %v1381_v60 = vshrl.u32 %v1318_v56, 16 }
 0x3c1   : > { %1449 = vxpose.xlu0.c.b16.start.end [1/1] (short) (narrow) %v1371_v41, 16  ;;  %1385 = vxpose.xlu1.c.b16.start.end [1/1] (short) (narrow) %v1355_v42, 16  ;;  %v1359_v51 = vpack.i.b16 %v1358_v43, %v1357_v47  ;;  %v1375_v52 = vpack.i.b16 %v1374_v44, %v1373_v48 }
 0x3c2   : > { %v1366_v53 = vshrl.u32 %v1351_v46, 16  ;;  %v1363_v57 = vpack.i.b16 %v1351_v46, %v1317_v49  ;;  %v1382_v59 = vshrl.u32 %v1352_v54, 16  ;;  %v1379_v61 = vpack.i.b16 %v1352_v54, %v1318_v56 }
 0x3c4   : > { %v1367_v58 = vpack.i.b16 %v1366_v53, %v1365_v55  ;;  %v1383_v62 = vpack.i.b16 %v1382_v59, %v1381_v60  ;;  %v836_v63 = vpop.permute.xlu1 %835 }
 0x3c5   : > { %1401 = vxpose.xlu0.c.b16.start.end [1/1] (short) (narrow) %v1359_v51, 16  ;;  %1465 = vxpose.xlu1.c.b16.start.end [1/1] (short) (narrow) %v1375_v52, 16 }
 0x3c8   : > { %v842_v1 = vpop.permute.xlu1 %841 }
 0x3c9   : > { %1417 = vxpose.xlu0.c.b16.start.end [1/1] (short) (narrow) %v1363_v57, 16  ;;  %1433 = vxpose.xlu1.c.b16.start.end [1/1] (short) (narrow) %v1367_v58, 16  ;;  %v860_v4 = vcombine.low %v836_v63, %v842_v1  ;;  %v861_v5 = vcombine.high %v836_v63, %v842_v1 }
 0x3cb   : > { %v839_v0 = vpop.permute.xlu0 %838 }
 0x3cc   : > { %v844_v2 = vcombine.low %v4014_v8, %v839_v0  ;;  %v845_v3 = vcombine.high %v4014_v8, %v839_v0 }
 0x3cd   : > { %1481 = vxpose.xlu0.c.b16.start.end [1/1] (short) (narrow) %v1379_v61, 16  ;;  %1497 = vxpose.xlu1.c.b16.start.end [1/1] (short) (narrow) %v1383_v62, 16 }
 0x3ce   : > { %v852_v6 = vrot.slane %v844_v2, %v3996_v40  ;;  %v859_v7 = vrot.slane %v845_v3, %v3996_v40 }
 0x3d1   : > { %1001 = vrot.lane.b32.xlu1 %v3983_v27, %s3713_s5  ;;  %v868_v27 = vrot.slane %v860_v4, %v3996_v40 }
 0x3d3   : > { %v877_v10 = vcombine.high %v852_v6, %v868_v27 }
 0x3d5   : > { %1003 = vrot.lane.b32.xlu1 %v3986_v28, %s3713_s5  ;;  %v875_v28 = vrot.slane %v861_v5, %v3996_v40  ;;  %v891_v13 = vrot.slane %v877_v10, %v4002_v50 }
 0x3d6   : > { %999 = vrot.lane.b32.xlu0 %v3974_v23, %s3713_s5  ;;  %v876_v23 = vcombine.low %v852_v6, %v868_v27 }
 0x3d7   : > { %v893_v11 = vcombine.high %v859_v7, %v875_v28  ;;  %v909_v18 = vcombine.high %v891_v13, %v3704_v9 }
 0x3d8   : > { %v884_v12 = vrot.slane %v876_v23, %v4002_v50 }
 0x3d9   : > { %v907_v14 = vrot.slane %v893_v11, %v4002_v50 }
 0x3da   : > { %1005 = vrot.lane.b32.xlu0 %v3989_v29, %s3713_s5  ;;  %v892_v29 = vcombine.low %v859_v7, %v875_v28  ;;  %v908_v17 = vcombine.high %v884_v12, %v3704_v9 }
 0x3db   : > { %v911_v20 = vcombine.high %v907_v14, %v3704_v9  ;;  %v3300_v30 = vpack.c.bf16 %v907_v14, %v891_v13 }
 0x3dc   : > { %v900_v8 = vrot.slane %v892_v29, %v4002_v50 }
 0x3dd   : > { %v3302_v25 = vpack.c.bf16 %v911_v20, %v909_v18  ;;  %v1110_v41 = vrot.slane %v3300_v30, %v3996_v40 }
 0x3de   : > { %v910_v19 = vcombine.high %v900_v8, %v3704_v9  ;;  %v3299_v26 = vpack.c.bf16 %v900_v8, %v884_v12 }
 0x3df   : > { %v1135_v36 = vrot.slane %v3302_v25, %v3996_v40 }
 0x3e0   : > { %v3301_v24 = vpack.c.bf16 %v910_v19, %v908_v17  ;;  %v1102_v39 = vrot.slane %v3299_v26, %v3996_v40  ;;  %v733_v17 = vand.u32 127, %v730_v31 }
 0x3e2   : > { %v1127_v34 = vrot.slane %v3301_v24, %v3996_v40  ;;  %v1111_v53 = vcombine.low %v1102_v39, %v1110_v41  ;;  %vm734_vm5 = vcmp.le.s32.totalorder %v733_v17, %v3993_v35 }
 0x3e4   : > { %v1136_v47 = vcombine.low %v1127_v34, %v1135_v36  ;;  %v1118_v59 = vrot.slane %v1111_v53, %v4002_v50 }
 0x3e6   : > { %v1143_v58 = vrot.slane %v1136_v47, %v4002_v50  ;;  %v1119_v7 = vcombine.high %v1118_v59, %v3712_v45  ;;  %v1148_v11 = vshrl.u32 %v1118_v59, 16 }
 0x3e8   : > { %v1144_v3 = vcombine.high %v1143_v58, %v3712_v45  ;;  %v1147_v6 = vpack.i.b16 %v1143_v58, %v1118_v59  ;;  %v1149_v29 = vshrl.u32 %v1143_v58, 16 }
 0x3ea   : > { %v1153_v10 = vpack.i.b16 %v1144_v3, %v1119_v7  ;;  %v1150_v13 = vpack.i.b16 %v1149_v29, %v1148_v11  ;;  %v1155_v14 = vshrl.u32 %v1144_v3, 16 }
 0x427   : > { %v1457_v15 = vpop.trf.xlu0  ;;  %v1393_v16 = vpop.trf.xlu1 }
 0x428   : > { %v1513_v37 = vcombine.low %v1393_v16, %v1457_v15  ;;  %v1154_v15 = vshrl.u32 %v1119_v7, 16 }
 0x42a   : > { %v1520_v48 = vrot.slane %v1513_v37, %v3996_v40  ;;  %v1156_v16 = vpack.i.b16 %v1155_v14, %v1154_v15 }
 0x42b   : > { %v1409_v21 = vpop.trf.xlu0  ;;  %v1473_v22 = vpop.trf.xlu1 }
 0x42c   : > { %v1538_v38 = vcombine.low %v1409_v21, %v1473_v22 }
 0x42e   : > { %v1545_v49 = vrot.slane %v1538_v38, %v3996_v40 }
 0x42f   : > { %v1425_v32 = vpop.trf.xlu0  ;;  %v1441_v33 = vpop.trf.xlu1 }
 0x433   : > { %v1489_v42 = vpop.trf.xlu0  ;;  %v1505_v43 = vpop.trf.xlu1 }
 0x434   : > { %v1521_v44 = vcombine.low %v1425_v32, %v1489_v42  ;;  %v1546_v46 = vcombine.low %v1441_v33, %v1505_v43 }
 0x436   : > { %v1528_v51 = vrot.slane %v1521_v44, %v3996_v40  ;;  %v1553_v52 = vrot.slane %v1546_v46, %v3996_v40 }
 0x438   : > { %v1529_v54 = vcombine.low %v1520_v48, %v1528_v51  ;;  %v1554_v55 = vcombine.low %v1545_v49, %v1553_v52 }
 0x43a   : > { %v1536_v56 = vrot.slane %v1529_v54, %v4002_v50  ;;  %v1561_v57 = vrot.slane %v1554_v55, %v4002_v50 }
 0x43c   : > { %v1565_v60 = vpack.i.b16 %v1561_v57, %v1536_v56  ;;  %v1537_v61 = vcombine.high %v1536_v56, %v3712_v45  ;;  %v1562_v62 = vcombine.high %v1561_v57, %v3712_v45  ;;  %v1566_v63 = vshrl.u32 %v1536_v56, 16 }
 0x43d   : > { %v1567_v0 = vshrl.u32 %v1561_v57, 16 }
 0x43e   : > { %v1581_v1 = vsel %vm1579_vm3, %v1565_v60, 0  ;;  %v1571_v2 = vpack.i.b16 %v1562_v62, %v1537_v61  ;;  %v1572_v27 = vshrl.u32 %v1537_v61, 16  ;;  %v1573_v28 = vshrl.u32 %v1562_v62, 16 }
 0x43f   : > { %3392 = vmatpush3.bf16.msra.mxu1 %v1581_v1  ;;  %v1568_v4 = vpack.i.b16 %v1567_v0, %v1566_v63 }
 0x440   : > { %v1673_v5 = vsel %vm1579_vm3, %v1571_v2, 0  ;;  %3397 = vmatprep.subr.bf16.mxu1 %v3704_v9  ;;  %v1574_v12 = vpack.i.b16 %v1573_v28, %v1572_v27 }
 0x441   : > { %3404 = vmatpush3.bf16.msra.mxu0 %v1673_v5  ;;  %v1627_v23 = vsel %vm1579_vm3, %v1568_v4, 0 }
 0x442   : > { %3394 = vmatmul.mubr.msk.bf16.vlgmr.msra.gmra.mrb[4].mxu1 %vm1575_vm4, %v1147_v6  ;;  %3415 = vmatprep.subr.bf16.mxu0 %v3704_v9  ;;  %v1719_v8 = vsel %vm1579_vm3, %v1574_v12, 0 }
 0x443   : > { %3398 = vmatpush3.bf16.msra.mxu1 %v1627_v23  ;;  %3399 = vmatprep.mubr.msk.bf16.mxu1 %vm3705_vm2, %v3704_v9  ;;  %v1002_v49 = vpop.permute.xlu1 %1001 }
 0x444   : > { %3406 = vmatmul.mubr.msk.bf16.vlgmr.msra.gmra.mrb[0].mxu0 %vm1575_vm4, %v1153_v10  ;;  %3409 = vmatprep.subr.bf16.mxu1 %v3704_v9 }
 0x445   : > { %3417 = vmatprep.mubr.msk.bf16.mxu0 %vm3705_vm2, %v3704_v9 }
 0x447   : > { %v1004_v52 = vpop.permute.xlu1 %1003 }
 0x448   : > { %v1000_v48 = vpop.permute.xlu0 %999 }
 0x449   : > { %v1011_v54 = vcombine.low %v1000_v48, %v1004_v52  ;;  %v1012_v35 = vcombine.high %v1000_v48, %v1004_v52 }
 0x44a   : > { %3400 = vmatmul.mubr.msk.bf16.vlgmr.msra.gmra.mrb[8].mxu1 %vm1575_vm4, %v1150_v13 }
 0x44b   : > { %3410 = vmatpush3.bf16.msra.mxu1 %v1719_v8  ;;  %3411 = vmatprep.mubr.msk.bf16.mxu1 %vm3705_vm2, %v3704_v9  ;;  %v1019_v56 = vrot.slane %v1011_v54, %v3996_v40  ;;  %v1026_v63 = vrot.slane %v1012_v35, %v3996_v40 }
 0x44c   : > { %3421 = vmatprep.subr.bf16.mxu1 %v3704_v9  ;;  %v1006_v51 = vpop.permute.xlu0 %1005 }
 0x44d   : > { %v1027_v53 = vcombine.low %v1002_v49, %v1006_v51  ;;  %v1028_v58 = vcombine.high %v1002_v49, %v1006_v51 }
 0x44f   : > { %v1035_v55 = vrot.slane %v1027_v53, %v3996_v40  ;;  %v1042_v60 = vrot.slane %v1028_v58, %v3996_v40 }
 0x451   : > { %v1043_v57 = vcombine.low %v1019_v56, %v1035_v55  ;;  %v1044_v62 = vcombine.high %v1019_v56, %v1035_v55  ;;  %v1059_v2 = vcombine.low %v1026_v63, %v1042_v60  ;;  %v1060_v6 = vcombine.high %v1026_v63, %v1042_v60 }
 0x452   : > { %3412 = vmatmul.mubr.msk.bf16.vlgmr.msra.gmra.mrb[12].mxu1 %vm1575_vm4, %v1156_v16 }
 0x453   : > { %3423 = vmatprep.mubr.msk.bf16.mxu1 %vm3705_vm2, %v3704_v9  ;;  %v1051_v59 = vrot.slane %v1043_v57, %v4002_v50  ;;  %v1058_v1 = vrot.slane %v1044_v62, %v4002_v50  ;;  %v1067_v5 = vrot.slane %v1059_v2, %v4002_v50  ;;  %v1074_v27 = vrot.slane %v1060_v6, %v4002_v50 }
 0x455   : > { %v1075_v61 = vcombine.high %v1051_v59, %v3704_v9  ;;  %v1817_v3 = vpack.c.bf16 %v1058_v1, %v1058_v1  ;;  %v1815_v4 = vpack.c.bf16 %v1051_v59, %v1051_v59  ;;  %v1819_v7 = vpack.c.bf16 %v1067_v5, %v1067_v5 }
 0x456   : > { %v1821_v28 = vpack.c.bf16 %v1074_v27, %v1074_v27  ;;  %v1076_v10 = vcombine.high %v1058_v1, %v3704_v9  ;;  %v1077_v11 = vcombine.high %v1067_v5, %v3704_v9  ;;  %v1078_v13 = vcombine.high %v1074_v27, %v3704_v9 }
 0x457   : > { %v1816_v0 = vpack.c.bf16 %v1075_v61, %v1075_v61 }
 0x458   : > { %v1818_v29 = vpack.c.bf16 %v1076_v10, %v1076_v10  ;;  %v1820_v12 = vpack.c.bf16 %v1077_v11, %v1077_v11  ;;  %v1822_v8 = vpack.c.bf16 %v1078_v13, %v1078_v13 }
 0x515   : > { %v1617_v18 = vpop.f32.mrb[4].mxu1 }
 0x516   : > { %v4092_v19 = vsel %vm734_vm5, %v1617_v18, -1e+30  ;;  %v3395_v20 = vpop.f32.mrb[5].mxu1 }
 0x517   : > { %v1620_v21 = vpop.f32.mrb[6].mxu1  ;;  %v1709_v22 = vpop.f32.mrb[0].mxu0  ;;  %v1767_v24 = vsel %vm1575_vm4, %v4092_v19, -inf }
 0x518   : > { %v4098_v25 = vsel %vm734_vm5, %v1709_v22, -1e+30  ;;  %v3407_v26 = vpop.f32.mrb[1].mxu0  ;;  %1768 = vmax.xlane.f32.xlu0 %v1767_v24  ;;  %v3396_v31 = vpop.f32.mrb[7].mxu1 }
 0x519   : > { %v1712_v30 = vpop.f32.mrb[2].mxu0  ;;  %v1773_v33 = vsel %vm1575_vm4, %v4098_v25, -inf }
 0x51a   : > { %v3408_v32 = vpop.f32.mrb[3].mxu0 }
 0x51c   : > { %1774 = vmax.xlane.f32.xlu0 %v1773_v33 }
 0x51d   : > { %v1663_v34 = vpop.f32.mrb[8].mxu1 }
 0x51e   : > { %v4104_v36 = vsel %vm734_vm5, %v1663_v34, -1e+30  ;;  %v3401_v37 = vpop.f32.mrb[9].mxu1 }
 0x51f   : > { %v1666_v38 = vpop.f32.mrb[10].mxu1  ;;  %v1770_v39 = vsel %vm1575_vm4, %v4104_v36, -inf }
 0x520   : > { %1771 = vmax.xlane.f32.xlu1 %v1770_v39  ;;  %v3402_v41 = vpop.f32.mrb[11].mxu1 }
 0x525   : > { %v1755_v42 = vpop.f32.mrb[12].mxu1 }
 0x526   : > { %v4110_v43 = vsel %vm734_vm5, %v1755_v42, -1e+30  ;;  %v3413_v44 = vpop.f32.mrb[13].mxu1 }
 0x527   : > { %v1758_v46 = vpop.f32.mrb[14].mxu1  ;;  %v1776_v23 = vsel %vm1575_vm4, %v4110_v43, -inf }
 0x528   : > { %v3414_v47 = vpop.f32.mrb[15].mxu1 }
 0x549   : > { %1839 = vxpose.xlu0.c.b16.start.end [1/1] (short) (narrow) %v1816_v0, 16 }
 0x54d   : > { %1855 = vxpose.xlu0.c.b16.start.end [1/1] (short) (narrow) %v1817_v3, 16  ;;  %1823 = vxpose.xlu1.c.b16.start.end [1/1] (short) (narrow) %v1815_v4, 16 }
 0x551   : > { %1887 = vxpose.xlu0.c.b16.start.end [1/1] (short) (narrow) %v1819_v7, 16 }
 0x555   : > { %1919 = vxpose.xlu0.c.b16.start.end [1/1] (short) (narrow) %v1821_v28, 16 }
 0x55a   : > { %1777 = vmax.xlane.f32.xlu1 %v1776_v23 }
 0x587   : > { %1871 = vxpose.xlu1.c.b16.start.end [1/1] (short) (narrow) %v1818_v29, 16 }
 0x58b   : > { %1903 = vxpose.xlu1.c.b16.start.end [1/1] (short) (narrow) %v1820_v12, 16 }
 0x58f   : > { %1935 = vxpose.xlu1.c.b16.start.end [1/1] (short) (narrow) %v1822_v8, 16 }
 0x5a5   : > { %v1769_v14 = vpop.xlane.xlu0 %1768 }
 0x5a6   : > { %v1779_v57 = vsub.f32 %v4092_v19, %v1769_v14 }
 0x5a8   : > { %v1783_v0 = vmul.f32 1.442695, %v1779_v57 }
 0x5a9   : > { %v1775_v15 = vpop.xlane.xlu0 %1774 }
 0x5aa   : > { %v1781_v1 = vsub.f32 %v4098_v25, %v1775_v15  ;;  %3585 = vpow2.f32 %v1783_v0 }
 0x5ac   : > { %v1787_v7 = vmul.f32 1.442695, %v1781_v1 }
 0x5ad   : > { %v1772_v18 = vpop.xlane.xlu1 %1771 }
 0x5ae   : > { %v1780_v60 = vsub.f32 %v4104_v36, %v1772_v18 }
 0x5af   : > { %v1847_v16 = vpop.trf.xlu0 }
 0x5b0   : > { %v1785_v4 = vmul.f32 1.442695, %v1780_v60 }
 0x5b2   : > { %3587 = vpow2.f32 %v1785_v4 }
 0x5b3   : > { %v1863_v17 = vpop.trf.xlu0  ;;  %v1831_v20 = vpop.trf.xlu1  ;;  %3589 = vpow2.f32 %v1787_v7 }
 0x5b4   : > { %v3586_v28 = vpop.eup %3585 }
 0x5b5   : > { %v1791_v23 = vsel %vm1575_vm4, %v3586_v28, 0.0 }
 0x5b7   : > { %v1895_v21 = vpop.trf.xlu0 }
 0x5b8   : > { %v1951_v26 = vcombine.low %v1831_v20, %v1895_v21 }
 0x5ba   : > { %v1958_v32 = vrot.slane %v1951_v26, %v3996_v40 }
 0x5bb   : > { %v1927_v24 = vpop.trf.xlu0 }
 0x5bc   : > { %v1959_v31 = vcombine.low %v1863_v17, %v1927_v24  ;;  %v3588_v25 = vpop.eup %3587 }
 0x5bd   : > { %v3590_v10 = vpop.eup %3589 }
 0x5be   : > { %v1966_v33 = vrot.slane %v1959_v31, %v3996_v40  ;;  %v1797_v11 = vsel %vm1575_vm4, %v3590_v10, 0.0 }
 0x5c0   : > { %v1967_v38 = vcombine.low %v1958_v32, %v1966_v33  ;;  %v1968_v51 = vcombine.high %v1958_v32, %v1966_v33 }
 0x5c2   : > { %v1975_v46 = vrot.slane %v1967_v38, %v4002_v50  ;;  %v1982_v63 = vrot.slane %v1968_v51, %v4002_v50 }
 0x5c4   : > { %v2023_v52 = vshrl.u32 %v1975_v46, 16  ;;  %v1983_v55 = vcombine.high %v1975_v46, %v3712_v45  ;;  %v2039_v6 = vshrl.u32 %v1982_v63, 16  ;;  %v1984_v8 = vcombine.high %v1982_v63, %v3712_v45 }
 0x5c6   : > { %v2031_v62 = vshrl.u32 %v1983_v55, 16 }
 0x5e7   : > { %v1778_v22 = vpop.xlane.xlu1 %1777 }
 0x5e8   : > { %v1782_v19 = vsub.f32 %v4110_v43, %v1778_v22  ;;  %v1794_v43 = vsel %vm1575_vm4, %v3588_v25, 0.0 }
 0x5ea   : > { %v1789_v27 = vmul.f32 1.442695, %v1782_v19 }
 0x5ec   : > { %3591 = vpow2.f32 %v1789_v27 }
 0x5ed   : > { %v1879_v30 = vpop.trf.xlu1 }
 0x5f1   : > { %v1911_v34 = vpop.trf.xlu1 }
 0x5f2   : > { %v1985_v37 = vcombine.low %v1847_v16, %v1911_v34  ;;  %v2047_v16 = vshrl.u32 %v1984_v8, 16 }
 0x5f4   : > { %v1992_v42 = vrot.slane %v1985_v37, %v3996_v40 }
 0x5f5   : > { %v1943_v39 = vpop.trf.xlu1 }
 0x5f6   : > { %v1993_v41 = vcombine.low %v1879_v30, %v1943_v39  ;;  %v3592_v29 = vpop.eup %3591 }
 0x5f7   : > { %v1800_v12 = vsel %vm1575_vm4, %v3592_v29, 0.0 }
 0x5f8   : > { %v2000_v44 = vrot.slane %v1993_v41, %v3996_v40 }
 0x5fa   : > { %v2001_v47 = vcombine.low %v1992_v42, %v2000_v44  ;;  %v2002_v48 = vcombine.high %v1992_v42, %v2000_v44 }
 0x5fc   : > { %v2009_v49 = vrot.slane %v2001_v47, %v4002_v50  ;;  %v2016_v35 = vrot.slane %v2002_v48, %v4002_v50 }
 0x5fe   : > { %v2021_v53 = vpack.i.b16 %v2009_v49, %v1975_v46  ;;  %v2024_v54 = vshrl.u32 %v2009_v49, 16  ;;  %v2017_v56 = vcombine.high %v2009_v49, %v3712_v45  ;;  %v2040_v3 = vshrl.u32 %v2016_v35, 16 }
 0x5ff   : > { %v2037_v5 = vpack.i.b16 %v2016_v35, %v1982_v63  ;;  %v2018_v13 = vcombine.high %v2016_v35, %v3712_v45 }
 0x600   : > { %2051 = vxpose.xlu0.c.b16.start.end [1/1] (short) (narrow) %v2021_v53, 16  ;;  %v2025_v58 = vpack.i.b16 %v2024_v54, %v2023_v52  ;;  %v2032_v59 = vshrl.u32 %v2017_v56, 16  ;;  %v2029_v61 = vpack.i.b16 %v2017_v56, %v1983_v55  ;;  %v2041_v36 = vpack.i.b16 %v2040_v3, %v2039_v6 }
 0x601   : > { %v2048_v14 = vshrl.u32 %v2018_v13, 16  ;;  %v2045_v15 = vpack.i.b16 %v2018_v13, %v1984_v8 }
 0x602   : > { %2067 = vxpose.xlu1.c.b16.start.end [1/1] (short) (narrow) %v2025_v58, 16  ;;  %v2033_v2 = vpack.i.b16 %v2032_v59, %v2031_v62 }
 0x603   : > { %v2049_v17 = vpack.i.b16 %v2048_v14, %v2047_v16 }
 0x604   : > { %2083 = vxpose.xlu0.c.b16.start.end [1/1] (short) (narrow) %v2029_v61, 16 }
 0x606   : > { %2099 = vxpose.xlu1.c.b16.start.end [1/1] (short) (narrow) %v2033_v2, 16 }
 0x608   : > { %2115 = vxpose.xlu0.c.b16.start.end [1/1] (short) (narrow) %v2037_v5, 16 }
 0x60a   : > { %2131 = vxpose.xlu1.c.b16.start.end [1/1] (short) (narrow) %v2041_v36, 16 }
 0x615   : > { %1792 = vadd.xlane.f32.xlu0 %v1791_v23 }
 0x617   : > { %1795 = vadd.xlane.f32.xlu1 %v1794_v43 }
 0x619   : > { %1798 = vadd.xlane.f32.xlu0 %v1797_v11 }
 0x61b   : > { %1801 = vadd.xlane.f32.xlu1 %v1800_v12 }
 0x646   : > { %2147 = vxpose.xlu0.c.b16.start.end [1/1] (short) (narrow) %v2045_v15, 16 }
 0x648   : > { %2163 = vxpose.xlu1.c.b16.start.end [1/1] (short) (narrow) %v2049_v17, 16 }
 0x666   : > { %v2059_v18 = vpop.trf.xlu0 }
 0x668   : > { %v2075_v20 = vpop.trf.xlu1 }
 0x66a   : > { %v2091_v21 = vpop.trf.xlu0 }
 0x66c   : > { %v2107_v22 = vpop.trf.xlu1 }
 0x66e   : > { %v2123_v24 = vpop.trf.xlu0 }
 0x66f   : > { %v2179_v34 = vcombine.low %v2059_v18, %v2123_v24 }
 0x670   : > { %v2139_v26 = vpop.trf.xlu1 }
 0x671   : > { %v2204_v39 = vcombine.low %v2075_v20, %v2139_v26  ;;  %v2186_v47 = vrot.slane %v2179_v34, %v3996_v40 }
 0x673   : > { %v2211_v54 = vrot.slane %v2204_v39, %v3996_v40 }
 0x6a2   : > { %v1793_v31 = vpop.xlane.xlu0 %1792 }
 0x6a3   : > { %3593 = vrcp.f32 %v1793_v31 }
 0x6a4   : > { %v1796_v30 = vpop.xlane.xlu1 %1795 }
 0x6a5   : > { %3595 = vrcp.f32 %v1796_v30 }
 0x6a6   : > { %v1799_v32 = vpop.xlane.xlu0 %1798 }
 0x6a7   : > { %3597 = vrcp.f32 %v1799_v32 }
 0x6a8   : > { %v1802_v33 = vpop.xlane.xlu1 %1801 }
 0x6a9   : > { %3599 = vrcp.f32 %v1802_v33 }
 0x6ac   : > { %v2155_v37 = vpop.trf.xlu0 }
 0x6ad   : > { %v3594_v38 = vpop.eup %3593  ;;  %v2187_v41 = vcombine.low %v2091_v21, %v2155_v37 }
 0x6ae   : > { %v2171_v42 = vpop.trf.xlu1  ;;  %v1807_v44 = vmul.f32 %v3594_v38, %v3586_v28 }
 0x6af   : > { %v3596_v46 = vpop.eup %3595  ;;  %v2194_v48 = vrot.slane %v2187_v41, %v3996_v40  ;;  %v2212_v49 = vcombine.low %v2107_v22, %v2171_v42 }
 0x6b0   : > { %v1811_v51 = vpack.c.bf16 %v1807_v44, %v1807_v44  ;;  %v1808_v52 = vmul.f32 %v3596_v46, %v3588_v25 }
 0x6b1   : > { %v3598_v53 = vpop.eup %3597  ;;  %v2195_v55 = vcombine.low %v2186_v47, %v2194_v48  ;;  %v2219_v56 = vrot.slane %v2212_v49, %v3996_v40 }
 0x6b2   : > { %v2245_v57 = vsel %vm1575_vm4, %v1811_v51, 0  ;;  %v1812_v58 = vpack.c.bf16 %v1808_v52, %v1808_v52  ;;  %v1809_v59 = vmul.f32 %v3598_v53, %v3590_v10  ;;  %v3571_v51 = vld [vmem:[%s3909_s20] sm:$0xff]  }
 0x6b3   : > { %v3600_v35 = vpop.eup %3599  ;;  %v2202_v60 = vrot.slane %v2195_v55, %v4002_v50  ;;  %v2220_v61 = vcombine.low %v2211_v54, %v2219_v56  ;;  %3416 = vmatpush3.bf16.xpose.msra.mxu0 %v2245_v57 }
 0x6b4   : > { %v2291_v62 = vsel %vm1575_vm4, %v1812_v58, 0  ;;  %3427 = vmatprep.subr.bf16.mxu0 %v3704_v9  ;;  %v1810_v63 = vmul.f32 %v3600_v35, %v3592_v29  ;;  %v1813_v1 = vpack.c.bf16 %v1809_v59, %v1809_v59  ;;  %v3572_v35 = vld [vmem:[%s3909_s20 + $0x8] sm:$0xff]   ;;  %s3714_s20 = smov 16  }
 0x6b5   : > { %v2227_v0 = vrot.slane %v2220_v61, %v4002_v50  ;;  %3422 = vmatpush3.bf16.xpose.msra.mxu1 %v2291_v62  ;;  %v2232_v2 = vshrl.u32 %v2202_v60, 16  ;;  %v2203_v36 = vcombine.high %v2202_v60, %v3712_v45 }
 0x6b6   : > { %3433 = vmatprep.subr.bf16.mxu1 %v3704_v9  ;;  %v1814_v19 = vpack.c.bf16 %v1810_v63, %v1810_v63  ;;  %v2337_v7 = vsel %vm1575_vm4, %v1813_v1, 0 }
 0x6b7   : > { %v2231_v3 = vpack.i.b16 %v2227_v0, %v2202_v60  ;;  %v2233_v4 = vshrl.u32 %v2227_v0, 16  ;;  %v2228_v6 = vcombine.high %v2227_v0, %v3712_v45  ;;  %v2238_v25 = vshrl.u32 %v2203_v36, 16 }
 0x6b8   : > { %v2383_v27 = vsel %vm1575_vm4, %v1814_v19, 0 }
 0x6b9   : > { %v2234_v5 = vpack.i.b16 %v2233_v4, %v2232_v2  ;;  %v2239_v28 = vshrl.u32 %v2228_v6, 16  ;;  %v2237_v23 = vpack.i.b16 %v2228_v6, %v2203_v36 }
 0x6ba   : > { %3418 = vmatmul.mubr.msk.bf16.vlgmr.msra.gmra.mrb[4].mxu0 %vm1575_vm4, %v2231_v3 }
 0x6bb   : > { %3428 = vmatpush3.bf16.xpose.msra.mxu0 %v2337_v7  ;;  %3429 = vmatprep.mubr.msk.bf16.mxu0 %vm3705_vm2, %v3704_v9  ;;  %v2240_v10 = vpack.i.b16 %v2239_v28, %v2238_v25 }
 0x6bc   : > { %3424 = vmatmul.mubr.msk.bf16.vlgmr.msra.gmra.mrb[16].mxu1 %vm1575_vm4, %v2234_v5  ;;  %3439 = vmatprep.subr.bf16.mxu0 %v3704_v9 }
 0x6bd   : > { %3434 = vmatpush3.bf16.xpose.msra.mxu1 %v2383_v27  ;;  %3435 = vmatprep.mubr.msk.bf16.mxu1 %vm3705_vm2, %v3704_v9 }
 0x6be   : > { %3447 = vmatprep.subr.bf16.mxu1 %v3704_v9 }
 0x6c2   : > { %3430 = vmatmul.mubr.msk.bf16.vlgmr.msra.gmra.mrb[8].mxu0 %vm1575_vm4, %v2237_v23 }
 0x6c3   : > { %3443 = vmatprep.mubr.msk.bf16.mxu0 %vm3705_vm2, %v3704_v9  ;;  %3440 = vmatpush3.bf16.msra.mxu0 %v3571_v51 }
 0x6c4   : > { %3436 = vmatmul.mubr.msk.bf16.vlgmr.msra.gmra.mrb[20].mxu1 %vm1575_vm4, %v2240_v10  ;;  %3441 = vmatprep.subr.bf16.mxu0 %v3704_v9 }
 0x6c5   : > { %3451 = vmatprep.mubr.msk.bf16.mxu1 %vm3705_vm2, %v3704_v9 }
 0x6c7   : > { %3442 = vmatpush3.bf16.msra.mxu0 %v3572_v35 }
 0x6c8   : > { %3455 = vmatprep.subr.bf16.mxu0 %v3704_v9 }
 0x78d   : > { %v2281_v45 = vpop.f32.mrb[4].mxu0 }
 0x78e   : > { %2425 = vxpose.xlu0.b32.start.end [1/1] (short) (narrow) %v2281_v45, 8  ;;  %v3419_v43 = vpop.f32.mrb[5].mxu0 }
 0x78f   : > { %v2284_v29 = vpop.f32.mrb[6].mxu0  ;;  %v2327_v11 = vpop.f32.mrb[16].mxu1 }
 0x790   : > { %v3420_v12 = vpop.f32.mrb[7].mxu0  ;;  %2457 = vxpose.xlu1.b32.start.end [1/1] (short) (narrow) %v2327_v11, 8  ;;  %v3425_v13 = vpop.f32.mrb[17].mxu1  ;;  %v3313_v29 = vld [vmem:[%s4387_s29] ss:$0 sm:$0xff] }
 0x791   : > { %v2330_v8 = vpop.f32.mrb[18].mxu1 }
 0x792   : > { %v3426_v14 = vpop.f32.mrb[19].mxu1 }
 0x793   : > { %v3603_v14 = vld [vmem:[#allocation2] sm:$0xff] }
 0x795   : > { %v2373_v15 = vpop.f32.mrb[8].mxu0 }
 0x796   : > { %2489 = vxpose.xlu0.b32.start.end [1/1] (short) (narrow) %v2373_v15, 8  ;;  %v3431_v16 = vpop.f32.mrb[9].mxu0 }
 0x797   : > { %v2376_v17 = vpop.f32.mrb[10].mxu0  ;;  %v2419_v18 = vpop.f32.mrb[20].mxu1 }
 0x798   : > { %v3432_v20 = vpop.f32.mrb[11].mxu0  ;;  %v3437_v21 = vpop.f32.mrb[21].mxu1 }
 0x799   : > { %v2422_v22 = vpop.f32.mrb[22].mxu1 }
 0x79a   : > { %2521 = vxpose.xlu0.b32.start.end [1/1] (short) (narrow) %v2419_v18, 8  ;;  %v3438_v24 = vpop.f32.mrb[23].mxu1 }
 0x80e   : > { %v2441_v26 = vpop.trf.xlu0 }
 0x810   : > { %v2473_v30 = vpop.trf.xlu1 }
 0x816   : > { %v2505_v31 = vpop.trf.xlu0 }
 0x817   : > { %v2553_v32 = vcombine.low %v2441_v26, %v2505_v31  ;;  %v2554_v33 = vcombine.high %v2441_v26, %v2505_v31  ;;  %v3573_v26 = vld [vmem:[%s3926_s19] sm:$0xff]   ;;  %v3574_v31 = vld [vmem:[%s3926_s19 + $0x8] sm:$0xff]  }
 0x818   : > { %3448 = vmatpush3.bf16.msra.mxu1 %v3573_v26 }
 0x819   : > { %v2561_v39 = vrot.slane %v2553_v32, %v3996_v40  ;;  %v2568_v41 = vrot.slane %v2554_v33, %v3996_v40  ;;  %3449 = vmatprep.subr.bf16.mxu1 %v3704_v9  ;;  %v3576_v32 = vld [vmem:[%s3940_s28 + $0x8] sm:$0xff]   ;;  %v3577_v33 = vld [vmem:[%s3940_s28 + $0x10] sm:$0xff]  }
 0x81a   : > { %v2537_v34 = vpop.trf.xlu0 }
 0x81b   : > { %v2569_v37 = vcombine.low %v2473_v30, %v2537_v34  ;;  %v2570_v38 = vcombine.high %v2473_v30, %v2537_v34  ;;  %v3575_v30 = vld [vmem:[%s3940_s28] sm:$0xff]   ;;  %v3578_v34 = vld [vmem:[%s3940_s28 + $0x18] sm:$0xff]  }
 0x81c   : > { %3450 = vmatpush3.bf16.msra.mxu1 %v3574_v31 }
 0x81d   : > { %v2577_v42 = vrot.slane %v2569_v37, %v3996_v40  ;;  %v2584_v44 = vrot.slane %v2570_v38, %v3996_v40  ;;  %v3579_v37 = vld [vmem:[%s3940_s28 + $0x20] sm:$0xff]   ;;  %v3580_v38 = vld [vmem:[%s3940_s28 + $0x28] sm:$0xff]  }
 0x81f   : > { %v2585_v46 = vcombine.low %v2561_v39, %v2577_v42  ;;  %v2586_v47 = vcombine.high %v2561_v39, %v2577_v42  ;;  %v2601_v48 = vcombine.low %v2568_v41, %v2584_v44  ;;  %v2602_v49 = vcombine.high %v2568_v41, %v2584_v44 }
 0x821   : > { %v2593_v52 = vrot.slane %v2585_v46, %v4002_v50  ;;  %v2600_v53 = vrot.slane %v2586_v47, %v4002_v50  ;;  %v2609_v54 = vrot.slane %v2601_v48, %v4002_v50  ;;  %v2616_v55 = vrot.slane %v2602_v49, %v4002_v50  ;;  %v3317_v46 = vld [vmem:[%s4388_s23] ss:$0 sm:$0xff] }
 0x822   : > { %v3318_v48 = vld [vmem:[%s704_s3] ss:$0 sm:$0xff] }
 0x823   : > { %v2621_v56 = vcombine.low %v2593_v52, %v2600_v53  ;;  %v3311_v57 = vcombine.high %v2593_v52, %v2600_v53  ;;  %v2637_v58 = vcombine.low %v2609_v54, %v2616_v55  ;;  %v3312_v59 = vcombine.high %v2609_v54, %v2616_v55  ;;  %v3581_v53 = vld [vmem:[%s3940_s28 + $0x30] sm:$0xff]   ;;  %v3582_v54 = vld [vmem:[%s3940_s28 + $0x38] sm:$0xff]   ;;  %v3319_v55 = vld [vmem:[%s712_s17] ss:$0 sm:$0xff]  ;;  %s4389_s28 = sld [smem:[#allocation9_spill]] }
 0x825   : > { %v2628_v60 = vrot.slane %v2621_v56, %v3996_v40  ;;  %v2636_v61 = vrot.slane %v3311_v57, %v3996_v40  ;;  %v2644_v62 = vrot.slane %v2637_v58, %v3996_v40  ;;  %v2652_v63 = vrot.slane %v3312_v59, %v3996_v40 }
 0x827   : > { %v2654_v0 = vcombine.high %v2628_v60, %v2636_v61  ;;  %v2670_v1 = vcombine.high %v2644_v62, %v2652_v63  ;;  %v2653_v2 = vcombine.low %v2628_v60, %v2636_v61  ;;  %v2669_v3 = vcombine.low %v2644_v62, %v2652_v63 }
 0x829   : > { %v2668_v4 = vrot.slane %v2654_v0, %v4002_v50  ;;  %v2684_v19 = vrot.slane %v2670_v1, %v4002_v50  ;;  %v2661_v5 = vrot.slane %v2653_v2, %v4002_v50  ;;  %v2677_v6 = vrot.slane %v2669_v3, %v4002_v50  ;;  %p3332_p1 = scmp.ne.s32.totalorder %s4389_s28, 1 }
 0x82a   : > { %s4390_s21 = sld [smem:[#allocation24_spill]] (!%p3332_p1)  ;;  %vm3718_vm8 = vmmov (!%p3332_p1), 0   ;;  %s4392_s24 = sld [smem:[#allocation23_spill]] (!%p3332_p1) }
 0x82b   : > { %v2687_v7 = vcombine.low %v2668_v4, %v2684_v19  ;;  %v2686_v36 = vcombine.high %v2661_v5, %v2677_v6  ;;  %v2685_v27 = vcombine.low %v2661_v5, %v2677_v6  ;;  %v2688_v40 = vcombine.high %v2668_v4, %v2684_v19  ;;  %s4393_s27 = sld [smem:[#allocation25_spill]] (!%p3332_p1) }
 0x82c   : > { %v3717_v6 = vmov (!%p3332_p1), 0.0  }
 0x82d   : > { %2694 = vrot.lane.b32.xlu1 %v2687_v7, %s3714_s20  ;;  %2690 = vrot.lane.b32.xlu0 %v2686_v36, %s3715_s14 }
 0x830   : > { %s4391_s20 = smov (!%p3332_p1), %s4390_s21  ;;  %v3604_v5 = vld [vmem:[%s4390_s21] sm:$0xff] (!%p3332_p1)  }
 0x831   : > { %2698 = vrot.lane.b32.xlu1 %v2688_v40, %s3716_s25  ;;  %v3605_v7 = vld [vmem:[%s4391_s20 + $0x8] sm:$0xff] (!%p3332_p1)  }
 0x89f   : > { %v2695_v28 = vpop.permute.xlu1 %2694  ;;  %v2691_v25 = vpop.permute.xlu0 %2690 }
 0x8a0   : > { %v2701_v23 = vsel %vm1575_vm4, %v2685_v27, %v2691_v25  ;;  %v3333_v25 = vld [vmem:[%s4392_s24] ss:$0 sm:$0xff] (!%p3332_p1) }
 0x8a1   : > { %v2703_v45 = vsel %vm2702_vm6, %v2701_v23, %v2695_v28 }
 0x8a3   : > { %v2699_v10 = vpop.permute.xlu1 %2698 }
 0x8a4   : > { %v2705_v50 = vsel %vm2704_vm7, %v2703_v45, %v2699_v10 }
 0x8a5   : > { %v2706_v43 = vpack.c.bf16 %v2705_v50, %v2705_v50  ;;  %v3334_v50 = vld [vmem:[%s4393_s27] ss:$0 sm:$0xff] (!%p3332_p1) }
 0x8a7   : > { %3444 = vmatmul.mubr.msk.bf16.vlgmr.msra.gmra.mrb[12].mxu0 %vm737_vm1, %v2706_v43 }
 0x8a8   : > { %3471 = vmatprep.mubr.msk.bf16.mxu0 %vm3705_vm2, %v3704_v9  ;;  %3456 = vmatpush3.bf16.msra.mxu0 %v3575_v30 }
 0x8a9   : > { %3457 = vmatprep.subr.bf16.mxu0 %v3704_v9 }
 0x8ac   : > { %3458 = vmatpush3.bf16.msra.mxu0 %v3576_v32 }
 0x8ad   : > { %3459 = vmatprep.subr.bf16.mxu0 %v3704_v9 }
 0x8b0   : > { %3460 = vmatpush3.bf16.msra.mxu0 %v3577_v33 }
 0x8b1   : > { %3461 = vmatprep.subr.bf16.mxu0 %v3704_v9 }
 0x8b4   : > { %3462 = vmatpush3.bf16.msra.mxu0 %v3578_v34 }
 0x8b5   : > { %3463 = vmatprep.subr.bf16.mxu0 %v3704_v9 }
 0x8b8   : > { %3464 = vmatpush3.bf16.msra.mxu0 %v3579_v37 }
 0x8b9   : > { %3465 = vmatprep.subr.bf16.mxu0 %v3704_v9 }
 0x8bc   : > { %3466 = vmatpush3.bf16.msra.mxu0 %v3580_v38 }
 0x8bd   : > { %3467 = vmatprep.subr.bf16.mxu0 %v3704_v9 }
 0x8c0   : > { %3468 = vmatpush3.bf16.msra.mxu0 %v3581_v53 }
 0x8c1   : > { %3469 = vmatprep.subr.bf16.mxu0 %v3704_v9  ;;  %v3323_v9 = vld [vmem:[%s720_s16] ss:$0 sm:$0xff] }
 0x8c4   : > { %3470 = vmatpush3.bf16.msra.mxu0 %v3582_v54 }
 0x8c5   : > { %3475 = vmatprep.subr.bf16.mxu0 (!%p3332_p1), %v3717_v6 }
 0x97a   : > { %v2767_v11 = vpop.f32.mrb[12].mxu0 }
 0x97b   : > { %v2768_v12 = vadd.f32 %v3313_v29, %v2767_v11  ;;  %v3445_v13 = vpop.f32.mrb[13].mxu0 }
 0x97c   : > { %v2770_v8 = vpop.f32.mrb[14].mxu0 }
 0x97d   : > { %v4203_v15 = vadd.f32 %v3603_v14, %v2768_v12  ;;  %v3446_v16 = vpop.f32.mrb[15].mxu0 }
 0x97f   : > { %v2776_v17 = vsel %vm737_vm1, %v4203_v15, 0.0 }
 0x980   : > { %2777 = vadd.xlane.f32.xlu1 %v2776_v17 }
 0xa0d   : > { %v2778_v18 = vpop.xlane.xlu1 %2777 }
 0xa0e   : > { %v2779_v20 = vmul.f32 0.03125, %v2778_v18 }
 0xa10   : > { %v2780_v21 = vsub.f32 %v4203_v15, %v2779_v20 }
 0xa12   : > { %v2781_v22 = vmul.f32 %v2780_v21, %v2780_v21 }
 0xa14   : > { %v2782_v24 = vsel %vm737_vm1, %v2781_v22, 0.0 }
 0xa15   : > { %2783 = vadd.xlane.f32.xlu0 %v2782_v24 }
 0xaa2   : > { %v2784_v39 = vpop.xlane.xlu0 %2783 }
 0xaa3   : > { %v2785_v41 = vmul.f32 0.03125, %v2784_v39 }
 0xaa5   : > { %v2786_v42 = vadd.f32 1e-05, %v2785_v41 }
 0xaa7   : > { %3601 = vrsqrt.f32 %v2786_v42 }
 0xab1   : > { %v3602_v44 = vpop.eup %3601 }
 0xab2   : > { %v2788_v47 = vmul.f32 %v3602_v44, %v2780_v21 }
 0xab4   : > { %v2795_v49 = vmul.f32 %v3317_v46, %v2788_v47 }
 0xab6   : > { %v2802_v51 = vadd.f32 %v3318_v48, %v2795_v49 }
 0xab8   : > { %v2803_v52 = vpack.c.bf16 %v2802_v51, %v2802_v51 }
 0xaba   : > { %3452 = vmatmul.mubr.msk.bf16.vlgmr.msra.gmra.mrb[24].mxu1 %vm737_vm1, %v2803_v52 }
 0xb8d   : > { %v2864_v56 = vpop.f32.mrb[24].mxu1 }
 0xb8e   : > { %v2865_v57 = vadd.f32 %v3319_v55, %v2864_v56  ;;  %v3453_v58 = vpop.f32.mrb[25].mxu1 }
 0xb8f   : > { %v2867_v59 = vpop.f32.mrb[26].mxu1 }
 0xb90   : > { %v2870_v35 = vmax.f32 %v2865_v57, 0.0  ;;  %v3454_v60 = vpop.f32.mrb[27].mxu1 }
 0xb92   : > { %v2871_v61 = vpack.c.bf16 %v2870_v35, %v2870_v35 }
 0xb94   : > { %3472 = vmatmul.mubr.bf16.vlgmr.msra.gmra.mrb[16].mxu0 %v2871_v61 }
 0xb95   : > { %3476 = vmatpush3.bf16.msra.mxu0 (!%p3332_p1), %v3604_v5  ;;  %3479 = vmatprep.mubr.msk.bf16.mxu0 (!%p3332_p1), %vm3718_vm8, %v3717_v6 }
 0xb96   : > { %3477 = vmatprep.subr.bf16.mxu0 (!%p3332_p1), %v3717_v6 }
 0xb99   : > { %3478 = vmatpush3.bf16.msra.mxu0 (!%p3332_p1), %v3605_v7 }
 0xc66   : > { %2988 = sbr.rel (%p3332_p1) target bundleno = 3561 (0xde9), region = 92 }
 0xc67   : > { %v2977_v62 = vpop.f32.mrb[16].mxu0 }
 0xc68   : > { %v2978_v63 = vadd.f32 %v3323_v9, %v2977_v62  ;;  %v3473_v0 = vpop.f32.mrb[17].mxu0 }
 0xc69   : > { %v2980_v1 = vpop.f32.mrb[18].mxu0 }
 0xc6a   : > { %v2983_v2 = vadd.f32 %v2978_v63, %v4203_v15  ;;  %v3474_v3 = vpop.f32.mrb[19].mxu0 }
 0xc6c   : > { %2984 = vst.msk [vmem:[#allocation2] sm:$0xff] %vm737_vm1, %v2983_v2  ;;  %v2989_v4 = vmul.f32 (!%p3332_p1), %v2983_v2, %v2983_v2 }
 0xc6e   : > { %v2990_v19 = vsel %vm737_vm1, %v2989_v4, 0.0 }
 0xc6f   : > { %2991 = vadd.xlane.f32.xlu0 %v2990_v19 }
 0xcfc   : > { %v2992_v36 = vpop.xlane.xlu0 %2991 }
 0xcfd   : > { %v2993_v27 = vmul.f32 0.03125, %v2992_v36 }
 0xcff   : > { %v2994_v40 = vadd.f32 1e-06, %v2993_v27 }
 0xd01   : > { %3606 = vrsqrt.f32 %v2994_v40 }
 0xd0b   : > { %v3607_v28 = vpop.eup %3606 }
 0xd0c   : > { %v2996_v23 = vmul.f32 %v3607_v28, %v2983_v2 }
 0xd0e   : > { %v3004_v10 = vmul.f32 %v3333_v25, %v2996_v23 }
 0xd10   : > { %v3005_v45 = vpack.c.bf16 %v3004_v10, %v3004_v10 }
 0xd12   : > { %3480 = vmatmul.mubr.msk.bf16.vlgmr.msra.gmra.mrb[0].mxu0 %vm737_vm1, %v3005_v45 }
 0xde5   : > { %v3066_v43 = vpop.f32.mrb[0].mxu0 }
 0xde6   : > { %v3067_v29 = vadd.f32 %v3334_v50, %v3066_v43  ;;  %v3481_v11 = vpop.f32.mrb[1].mxu0 }
 0xde7   : > { %v3069_v12 = vpop.f32.mrb[2].mxu0 }
 0xde8   : > { %3072 = vst [vmem:[%s672_s13] sm:$0xff] %v3067_v29  ;;  %v3482_v13 = vpop.f32.mrb[3].mxu0 }
 0xde9 PF: > { %s4394_s23 = sld [smem:[#allocation10_spill]]  ;;  %s4395_s0 = sld [smem:[#allocation7_spill]] }
 0xdea   : > { %s4397_s2 = sld [smem:[#allocation26_spill]]  ;;  %s3087_s17 = sshll.u32 %s672_s13, 4  ;;  %s3088_s17 = int_to_ptr.vmem [resolvable:$true] %s3087_s17 }
 0xdeb   : > { %s3608_s16 = scalar_lea.vmem %s3088_s17, 128  ;;  %s3719_s14 = smov [#allocation3]  }
 0xdec   : > { %p3609_p2 = scmp.ne.s32.totalorder %s3088_s17, %s3608_s16  ;;  %s3612_s25 = sshll.u32 %s3719_s14, 4  ;;  %s3613_s25 = int_to_ptr.vmem [resolvable:$false] %s3612_s25 }
 0xded   : > { %s3614_s30 = scalar_lea.vmem %s3613_s25, 256  ;;  %p3615_p6 = scmp.lt.s32.totalorder %s3088_s17, %s3613_s25 }
 0xdee   : > { %p3610_p4 = pnand %p3609_p2, %p3854_p3  ;;  %p3616_p7 = scmp.lt.s32.totalorder %s3614_s30, %s3608_s16 }
 0xdef   : > { %s3339_s18 = sshll.u32 %s4394_s23, 7  ;;  %s4398_s5 = sand.u32 1, %s4395_s0  }
 0xdf0   : > { %s4271_s28 = scalar_lea.hbm %s4397_s2, %s3339_s18  ;;  %s3074_s21 = scalar_lea.sflag [#allocation4], %s4398_s5 }
 0xdf1   : > { %p3611_p5 = pneg %p3610_p4  ;;  %p3617_p8 = por %p3616_p7, %p3615_p6 }
 0xdf3   : > { %p3618_p10 = pnand %p3617_p8, %p3611_p5 }
 0xdf5   : > { %3621 = shalt.err (!%p3618_p10)
}
 0xdf6   : > { %s3622_s26 = scalar_lea.hbm %s4271_s28, 128  ;;  %s3626_s29 = scalar_lea.hbm %s4397_s2, 256 }
 0xdf7   : > { %p3623_p11 = scmp.ne.s32.totalorder %s4271_s28, %s3622_s26  ;;  %p3627_p0 = scmp.lt.u32.totalorder %s4271_s28, %s4397_s2 }
 0xdf8   : > { %p3628_p1 = scmp.lt.u32.totalorder %s3626_s29, %s3622_s26  ;;  %p3630_p4 = scmp.lt.u32.totalorder %s3622_s26, %s4271_s28 }
 0xdf9   : > { %p3624_p12 = pnand %p3623_p11, %p3854_p3 }
 0xdfa   : > { %p3629_p2 = por %p3628_p1, %p3627_p0 }
 0xdfb   : > { %p3625_p13 = pneg %p3624_p12 }
 0xdfc   : > { %p3631_p5 = por %p3630_p4, %p3629_p2 }
 0xdfe   : > { %p3632_p6 = pnand %p3631_p5, %p3625_p13 }
 0xe00   : > { %3635 = shalt.err (!%p3632_p6)
}
 0xe01   : > { %3483 = dma.vmem_to_hbm [thread:$0]  (%p3854_p3), %s3088_s17, 128, %s4271_s28, %s3074_s21  }
 0xe02 PF: > { %s4399_s23 = sld [smem:[#allocation13_spill]]  ;;  %s4400_s0 = sld [smem:[#allocation6_spill]] }
 0xe08   : > { %p3489_p7 = scmp.ge.s32.totalorder %s4399_s23, 2  ;;  %s3099_s15 = sand.u32 1, %s4400_s0  }
 0xe09   : > { %s3100_s3 = scalar_lea.sflag [#allocation4], %s3099_s15 }
 0xe0a   : > { %p3486_p8 = pnand %p3489_p7, %p3864_p9 }
 0xe0c   : > { %3669 = dma.done.wait (!%p3486_p8), %s3100_s3, 128  }
 0xe0d   : > { %3671 = vsyncadd (!%p3486_p8), %s3100_s3, 4294967168  ;;  %s29_s28 = sadd.s32 1, %s4399_s23   ;;  %s4402_s21 = sld [smem:[#allocation7_spill]] }
 0xe0e   : > { %p26_p10 = scmp.ge.s32.totalorder %s29_s28, 6   ;;  %s4403_s22 = sld [smem:[#allocation8_spill]] }
 0xe0f   : > { %s4404_s23 = sld [smem:[#allocation18_spill]]  ;;  %s4405_s24 = sld [smem:[#allocation11_spill]] }
 0xe10   : > { %s4406_s25 = sld [smem:[#allocation12_spill]]  ;;  %s4407_s26 = sld [smem:[#allocation14_spill]] }
 0xe11   : > { %s4408_s27 = sld [smem:[#allocation16_spill]]  ;;  %28 = sbr.rel (!%p26_p10) target bundleno = 14 (0xe), region = 163 }
 0xe18   :  { %3105 = vsyncpa [#allocation4], 1 }
 0xe19   :  { %3107 = vsyncpa [#allocation4 + $0x1], 1 }

</bundles_post_ra>
